<compile_context>
chip_gen: v7x
topology: tpu7x:2x2x1
jax: 0.10.0
libtpu: 0.0.40
codegen_flags: <defaults>
</compile_context>

<pallas_src>
import functools

import jax
import jax.numpy as jnp
from jax.experimental import pallas as pl
from jax.experimental.pallas import tpu as pltpu

# ---- synthetic discriminator configuration (small, deterministic) ----------
B, C_IN, H, W = 2, 4, 16, 16
C1, C2 = 16, 32
KH = KW = 3
NEG_SLOPE = 0.2


def _softplus(t):
    # numerically stable softplus from TPU-friendly ops
    return jnp.maximum(t, 0.0) + jnp.log(1.0 + jnp.exp(-jnp.abs(t)))


# -----------------------------------------------------------------------------
# Pallas kernel (no grid — whole problem in one invocation).
#   patches_ref : (B*H*W, 9*C_IN)  im2col patches (batch folded into rows)
#   w1_ref      : (9*C_IN, C1)     3x3 conv taps, flattened to match patch order
#   w2_ref      : (C1, C2)         1x1 conv
#   pk_ref      : (4, 128)         packed small params: b1 | b2 | wfc | bfc
#   out_ref     : (1, 1) in SMEM   scalar loss
# -----------------------------------------------------------------------------
def _adv_loss_g_kernel(patches_ref, w1_ref, w2_ref, pk_ref, out_ref, *,
                       target, batch, hw):
    pk = pk_ref[...]                          # (4, 128); all slices start at lane 0
    b1 = pk[0:1, 0:C1]                        # (1, C1)
    b2 = pk[1:2, 0:C2]                        # (1, C2)
    wfc = pk[2:3, 0:C2]                       # (1, C2)
    bfc = pk[3:4, 0:1]                        # (1, 1)

    # ---- conv1 (3x3, pad=1) as ONE im2col matmul on the MXU
    y1 = jnp.dot(patches_ref[...], w1_ref[...],
                 preferred_element_type=jnp.float32) + b1          # (B*HW, C1)
    y1 = jnp.where(y1 > 0, y1, NEG_SLOPE * y1)                     # LeakyReLU

    # ---- conv2 (1x1) as one 2-D matmul
    y2 = jnp.dot(y1, w2_ref[...],
                 preferred_element_type=jnp.float32) + b2          # (B*HW, C2)
    y2 = jnp.where(y2 > 0, y2, NEG_SLOPE * y2)                     # LeakyReLU

    # ---- global average pool per sample (layout-trivial reshape: HW = 256 is
    #      a multiple of 8, last dim unchanged -> no relayout)
    pooled = jnp.sum(y2.reshape(batch, hw, C2), axis=1) * (1.0 / hw)   # (B, C2)

    # ---- final linear on the VPU (avoid an M=1,N=1 MXU push/pop on the tail)
    logit = jnp.sum(pooled * wfc, axis=-1, keepdims=True) + bfc        # (B, 1)

    # ---- BCE-with-logits, specialized at trace time (dead term elided)
    if target == 1.0:
        bce = _softplus(-logit)
    else:
        bce = target * _softplus(-logit) + (1.0 - target) * _softplus(logit)

    # batch-mean, written once to SMEM
    out_ref[0, 0] = jnp.sum(bce) * (1.0 / batch)


# -----------------------------------------------------------------------------
# Wrapper: Adversarial.forward semantics in eval mode.
# -----------------------------------------------------------------------------
@functools.partial(jax.jit, static_argnames=("smoothing",))
def adversarial_forward(params, z_d, real_d, fake_g, real_g, *, smoothing=False):
    """Eval-mode Adversarial.forward: discriminator loss is 0, returns loss_g.

    Vanilla-GAN name (no 'w'/'ls'/'ra'): loss_g = bce(real=D(fake_g)).
    """
    # TODO(synk): training branch (loss_d with autograd gradient penalty,
    #             loss.backward(), optimizer.step(), spectral norm) has no
    #             forward-only Pallas equivalent.
    del z_d, real_d, real_g  # unused by the vanilla-GAN generator loss in eval mode

    b, c, h, w = fake_g.shape
    hw = h * w

    # NCHW -> NHWC -> zero-pad(1) -> im2col patches (valid positions only).
    # Cheap glue, fused under jit; patch tensor is ~73 KB and DMA'd once, aligned.
    x = jnp.transpose(fake_g, (0, 2, 3, 1)).astype(jnp.float32)        # (B,H,W,C)
    xp = jnp.pad(x, ((0, 0), (1, 1), (1, 1), (0, 0)))                  # (B,H+2,W+2,C)
    wins = [xp[:, kh:kh + h, kw:kw + w, :]
            for kh in range(KH) for kw in range(KW)]                   # 9 x (B,H,W,C)
    patches = jnp.concatenate(wins, axis=-1).reshape(b * hw, KH * KW * c)

    # conv taps flattened to match patch column order: (kh*KW + kw)*C_IN + cin
    w1m = params["w1"].reshape(KH * KW * c, C1)

    # pack the small params into a single (4, 128) input (one DMA instead of 4)
    pk = jnp.zeros((4, 128), jnp.float32)
    pk = pk.at[0, :C1].set(params["b1"].reshape(C1))
    pk = pk.at[1, :C2].set(params["b2"].reshape(C2))
    pk = pk.at[2, :C2].set(params["wfc"].reshape(C2))
    pk = pk.at[3, 0].set(params["bfc"].reshape(()))

    target = 0.9 if smoothing else 1.0
    kernel = functools.partial(_adv_loss_g_kernel, target=target, batch=b, hw=hw)

    out = pl.pallas_call(
        kernel,
        out_shape=jax.ShapeDtypeStruct((1, 1), jnp.float32),
        in_specs=[
            pl.BlockSpec(memory_space=pltpu.MemorySpace.VMEM),   # patches
            pl.BlockSpec(memory_space=pltpu.MemorySpace.VMEM),   # w1 (im2col taps)
            pl.BlockSpec(memory_space=pltpu.MemorySpace.VMEM),   # w2 (1x1 conv)
            pl.BlockSpec(memory_space=pltpu.MemorySpace.VMEM),   # packed small params
        ],
        out_specs=pl.BlockSpec(memory_space=pltpu.MemorySpace.SMEM),
    )(patches, w1m, params["w2"], pk)

    return out[0, 0]


# -----------------------------------------------------------------------------
# Deterministic parameter init + pure-JAX reference for verification
# -----------------------------------------------------------------------------
def init_params(key):
    k1, k2, k3, k4, k5, k6 = jax.random.split(key, 6)
    return {
        "w1": 0.1 * jax.random.normal(k1, (KH, KW, C_IN, C1), jnp.float32),  # HWIO
        "b1": 0.1 * jax.random.normal(k2, (1, C1), jnp.float32),
        "w2": 0.1 * jax.random.normal(k3, (C1, C2), jnp.float32),            # 1x1 conv
        "b2": 0.1 * jax.random.normal(k4, (1, C2), jnp.float32),
        "wfc": 0.1 * jax.random.normal(k5, (C2, 1), jnp.float32),
        "bfc": 0.1 * jax.random.normal(k6, (1, 1), jnp.float32),
    }


def reference_forward(params, fake_g, *, smoothing=False):
    x = jnp.transpose(fake_g, (0, 2, 3, 1)).astype(jnp.float32)
    y1 = jax.lax.conv_general_dilated(
        x, params["w1"], window_strides=(1, 1), padding="SAME",
        dimension_numbers=("NHWC", "HWIO", "NHWC")) + params["b1"]
    y1 = jnp.where(y1 > 0, y1, NEG_SLOPE * y1)
    y2 = jnp.einsum("bhwc,cf->bhwf", y1, params["w2"]) + params["b2"]
    y2 = jnp.where(y2 > 0, y2, NEG_SLOPE * y2)
    pooled = y2.mean(axis=(1, 2))                                 # (B, C2)
    logits = pooled @ params["wfc"] + params["bfc"]               # (B, 1)
    target = 0.9 if smoothing else 1.0
    bce = target * _softplus(-logits) + (1.0 - target) * _softplus(logits)
    return bce.mean()


if __name__ == "__main__":
    key = jax.random.PRNGKey(0)
    kp, kz, krd, kfg, krg = jax.random.split(key, 5)
    params = init_params(kp)

    z_d = jax.random.normal(kz, (B, C_IN, H, W), jnp.float32)
    real_d = jax.random.normal(krd, (B, C_IN, H, W), jnp.float32)
    fake_g = jax.random.normal(kfg, (B, C_IN, H, W), jnp.float32)
    real_g = jax.random.normal(krg, (B, C_IN, H, W), jnp.float32)

    loss = adversarial_forward(params, z_d, real_d, fake_g, real_g, smoothing=False)
    loss = jax.block_until_ready(loss)

    ref = reference_forward(params, fake_g, smoothing=False)
    assert jnp.allclose(loss, ref, rtol=1e-4, atol=1e-5), (float(loss), float(ref))

    print("KERNEL_OK")
</pallas_src>

<mosaic_0001>
module attributes {stable_mosaic.version = 11 : i64} {
  func.func @_adv_loss_g_kernel(%arg0: memref<512x36xf32, #tpu.memory_space<vmem>>, %arg1: memref<36x16xf32, #tpu.memory_space<vmem>>, %arg2: memref<16x32xf32, #tpu.memory_space<vmem>>, %arg3: memref<4x128xf32, #tpu.memory_space<vmem>>, %arg4: memref<1x1xf32, #tpu.memory_space<smem>>) attributes {dimension_semantics = [], scalar_prefetch = 0 : i64, scratch_operands = 0 : i64, tpu.core_type = #tpu.core_type<tc>} {
    %c0 = arith.constant 0 : index
    %c0_0 = arith.constant 0 : index
    %0 = vector.load %arg3[%c0, %c0_0] : memref<4x128xf32, #tpu.memory_space<vmem>>, vector<4x128xf32>
    %1 = vector.extract_strided_slice %0 {offsets = [0, 0], sizes = [1, 16], strides = [1, 1]} : vector<4x128xf32> to vector<1x16xf32>
    %2 = vector.extract_strided_slice %0 {offsets = [1, 0], sizes = [1, 32], strides = [1, 1]} : vector<4x128xf32> to vector<1x32xf32>
    %3 = vector.extract_strided_slice %0 {offsets = [2, 0], sizes = [1, 32], strides = [1, 1]} : vector<4x128xf32> to vector<1x32xf32>
    %4 = vector.extract_strided_slice %0 {offsets = [3, 0], sizes = [1, 1], strides = [1, 1]} : vector<4x128xf32> to vector<1x1xf32>
    %c0_1 = arith.constant 0 : index
    %c0_2 = arith.constant 0 : index
    %5 = vector.load %arg0[%c0_1, %c0_2] : memref<512x36xf32, #tpu.memory_space<vmem>>, vector<512x36xf32>
    %c0_3 = arith.constant 0 : index
    %c0_4 = arith.constant 0 : index
    %6 = vector.load %arg1[%c0_3, %c0_4] : memref<36x16xf32, #tpu.memory_space<vmem>>, vector<36x16xf32>
    %cst = arith.constant dense<0.000000e+00> : vector<512x16xf32>
    %7 = tpu.matmul %5, %6, %cst {dimension_numbers = #tpu.dot_dimension_numbers<[1], [0], [0], [1], [0, 0, 1, 1], [], []>} : vector<512x36xf32>, vector<36x16xf32>, vector<512x16xf32> -> vector<512x16xf32>
    %8 = vector.broadcast %1 : vector<1x16xf32> to vector<512x16xf32>
    %9 = arith.addf %7, %8 : vector<512x16xf32>
    %cst_5 = arith.constant 0.000000e+00 : f32
    %10 = vector.broadcast %cst_5 : f32 to vector<512x16xf32>
    %11 = arith.cmpf ogt, %9, %10 : vector<512x16xf32>
    %cst_6 = arith.constant 2.000000e-01 : f32
    %12 = vector.broadcast %cst_6 : f32 to vector<512x16xf32>
    %13 = arith.mulf %12, %9 : vector<512x16xf32>
    %14 = arith.select %11, %9, %13 : vector<512x16xi1>, vector<512x16xf32>
    %c0_7 = arith.constant 0 : index
    %c0_8 = arith.constant 0 : index
    %15 = vector.load %arg2[%c0_7, %c0_8] : memref<16x32xf32, #tpu.memory_space<vmem>>, vector<16x32xf32>
    %cst_9 = arith.constant dense<0.000000e+00> : vector<512x32xf32>
    %16 = tpu.matmul %14, %15, %cst_9 {dimension_numbers = #tpu.dot_dimension_numbers<[1], [0], [0], [1], [0, 0, 1, 1], [], []>} : vector<512x16xf32>, vector<16x32xf32>, vector<512x32xf32> -> vector<512x32xf32>
    %17 = vector.broadcast %2 : vector<1x32xf32> to vector<512x32xf32>
    %18 = arith.addf %16, %17 : vector<512x32xf32>
    %cst_10 = arith.constant 0.000000e+00 : f32
    %19 = vector.broadcast %cst_10 : f32 to vector<512x32xf32>
    %20 = arith.cmpf ogt, %18, %19 : vector<512x32xf32>
    %cst_11 = arith.constant 2.000000e-01 : f32
    %21 = vector.broadcast %cst_11 : f32 to vector<512x32xf32>
    %22 = arith.mulf %21, %18 : vector<512x32xf32>
    %23 = arith.select %20, %18, %22 : vector<512x32xi1>, vector<512x32xf32>
    %24 = vector.shape_cast %23 : vector<512x32xf32> to vector<2x256x32xf32>
    %cst_12 = arith.constant dense<0.000000e+00> : vector<2x32xf32>
    %25 = vector.multi_reduction <add>, %24, %cst_12 [1] : vector<2x256x32xf32> to vector<2x32xf32>
    %cst_13 = arith.constant 3.906250e-03 : f32
    %26 = vector.broadcast %cst_13 : f32 to vector<2x32xf32>
    %27 = arith.mulf %25, %26 : vector<2x32xf32>
    %28 = vector.broadcast %3 : vector<1x32xf32> to vector<2x32xf32>
    %29 = arith.mulf %27, %28 : vector<2x32xf32>
    %cst_14 = arith.constant dense<0.000000e+00> : vector<2xf32>
    %30 = vector.multi_reduction <add>, %29, %cst_14 [1] : vector<2x32xf32> to vector<2xf32>
    %31 = vector.shape_cast %30 : vector<2xf32> to vector<2x1xf32>
    %32 = vector.broadcast %4 : vector<1x1xf32> to vector<2x1xf32>
    %33 = arith.addf %31, %32 : vector<2x1xf32>
    %cst_15 = arith.constant 0.000000e+00 : f32
    %34 = vector.broadcast %cst_15 : f32 to vector<2x1xf32>
    %35 = arith.subf %34, %33 : vector<2x1xf32>
    %cst_16 = arith.constant 0.000000e+00 : f32
    %36 = vector.broadcast %cst_16 : f32 to vector<2x1xf32>
    %37 = arith.maximumf %35, %36 : vector<2x1xf32>
    %38 = math.absf %35 : vector<2x1xf32>
    %cst_17 = arith.constant 0.000000e+00 : f32
    %39 = vector.broadcast %cst_17 : f32 to vector<2x1xf32>
    %40 = arith.subf %39, %38 : vector<2x1xf32>
    %41 = math.exp %40 : vector<2x1xf32>
    %cst_18 = arith.constant 1.000000e+00 : f32
    %42 = vector.broadcast %cst_18 : f32 to vector<2x1xf32>
    %43 = arith.addf %42, %41 : vector<2x1xf32>
    %44 = math.log %43 : vector<2x1xf32>
    %45 = arith.addf %37, %44 : vector<2x1xf32>
    %46 = vector.shape_cast %45 : vector<2x1xf32> to vector<1x2x1xf32>
    %cst_19 = arith.constant dense<0.000000e+00> : vector<1xf32>
    %47 = vector.multi_reduction <add>, %46, %cst_19 [1, 2] : vector<1x2x1xf32> to vector<1xf32>
    %48 = vector.shape_cast %47 : vector<1xf32> to vector<1x1x1xf32>
    %49 = vector.extract %48[0, 0, 0] : f32 from vector<1x1x1xf32>
    %cst_20 = arith.constant 5.000000e-01 : f32
    %50 = arith.mulf %49, %cst_20 : f32
    %c0_21 = arith.constant 0 : index
    %c0_22 = arith.constant 0 : index
    %51 = memref.load %arg4[%c0_21, %c0_22] : memref<1x1xf32, #tpu.memory_space<smem>>
    memref.store %50, %arg4[%c0_21, %c0_22] : memref<1x1xf32, #tpu.memory_space<smem>>
    return
  }
}

</mosaic_0001>

<bundles_post_ra>
// kernel: adversarial_forward.1
= control target key start
LH: loop header
LB: loop body
LE: loop exit
PB: predicated region body
PF: predicated region fallthrough
CT: control target
= control target key end

     0   :  { %vm92_vm0 = vcmask 293888   ;;  %vm285_vm1 = vcmask 1043456   ;;  %s2938_s0 = inlined_call_operand.vmem [shape: f32[512,36], index: 0, kind: input, shape index: {}]   ;;  %s2939_s1 = inlined_call_operand.vmem [shape: f32[36,16], index: 1, kind: input, shape index: {}]   ;;  %s2940_s2 = inlined_call_operand.vmem [shape: f32[16,32], index: 2, kind: input, shape index: {}]   ;;  %s2941_s3 = inlined_call_operand.vmem [shape: f32[4,128], index: 3, kind: input, shape index: {}]   ;;  %s2942_s4 = inlined_call_operand.hbm [shape: f32[1,1], index: 4, kind: output, shape index: {}]  }
   0x1   :  { %v83_v0 = vld [vmem:[%s2939_s1] sm:$0xff]  ;;  %v84_v1 = vld [vmem:[%s2939_s1 + $0x8] sm:$0xff]  ;;  %v85_v2 = vld [vmem:[%s2939_s1 + $0x10] sm:$0xff] }
   0x2   :  { %v2311_v3 = vpack.c.bf16 %v84_v1, %v83_v0  ;;  %v86_v4 = vld [vmem:[%s2939_s1 + $0x18] sm:$0xff]  ;;  %v19_v5 = vld [vmem:[%s2938_s0] sm:$0xff]  ;;  %v20_v8 = vld [vmem:[%s2938_s0 + $0x8] sm:$0xff] }
   0x3   :  { %v2315_v6 = vpack.c.bf16 %v86_v4, %v85_v2  ;;  %2115 = vmatprep.mubr.msk.f32.mxu0 %vm92_vm0, %v19_v5  ;;  %v87_v7 = vld [vmem:[%s2939_s1 + $0x20] sm:$0xf]  ;;  %v21_v9 = vld [vmem:[%s2938_s0 + $0x10] sm:$0xff]  ;;  %v22_v10 = vld [vmem:[%s2938_s0 + $0x18] sm:$0xff] }
   0x4   :  { %2312 = vmatprep.subr.bf16.mxu0 %v2311_v3  ;;  %v23_v11 = vld [vmem:[%s2938_s0 + $0x20] sm:$0xff]  ;;  %v24_v12 = vld [vmem:[%s2938_s0 + $0x28] sm:$0xff]  ;;  %v25_v13 = vld [vmem:[%s2938_s0 + $0x30] sm:$0xff] }
   0x5   :  { %2314 = vmatpush3.bf16.msra.mxu0 %v2311_v3  ;;  %v26_v14 = vld [vmem:[%s2938_s0 + $0x38] sm:$0xff]  ;;  %v27_v15 = vld [vmem:[%s2938_s0 + $0x40] sm:$0xff] }
   0x6   :  { %2316 = vmatprep.subr.bf16.mxu0 %v2315_v6 }
   0x9   :  { %2318 = vmatpush3.bf16.msra.mxu0 %v2315_v6 }
   0xa   :  { %2113 = vmatprep.subr.msk.mxu0 %vm285_vm1, %v87_v7 }
   0xd   :  { %2114 = vmatpush3.msk.msra.mxu0 %vm285_vm1, %v87_v7 }
   0xe   :  { %2116 = vmatmul.mubr.msk.f32.vlgmr.msra.gmra.mrb[0].mxu0 %vm92_vm0, %v20_v8 }
   0xf   :  { %2118 = vmatprep.mubr.msk.f32.mxu0 %vm92_vm0, %v21_v9 }
  0x12   :  { %2119 = vmatmul.mubr.msk.f32.gmra.mrb[2].mxu0 %vm92_vm0, %v22_v10 }
  0x13   :  { %2121 = vmatprep.mubr.msk.f32.mxu0 %vm92_vm0, %v23_v11 }
  0x16   :  { %2122 = vmatmul.mubr.msk.f32.gmra.mrb[4].mxu0 %vm92_vm0, %v24_v12 }
  0x17   :  { %2124 = vmatprep.mubr.msk.f32.mxu0 %vm92_vm0, %v25_v13 }
  0x18   :  { %9 = vsyncpa [#allocation3], 0  ;;  %v28_v16 = vld [vmem:[%s2938_s0 + $0x48] sm:$0xff]  ;;  %v29_v17 = vld [vmem:[%s2938_s0 + $0x50] sm:$0xff]  ;;  %v88_v10 = vlaneseq  ;;  %vm872_vm4 = vcmask 130048   ;;  %s2331_s26 = scalar_lea.hbm %s2942_s4, 16 }
  0x19   :  { %v30_v18 = vld [vmem:[%s2938_s0 + $0x58] sm:$0xff]  ;;  %v31_v19 = vld [vmem:[%s2938_s0 + $0x60] sm:$0xff]  ;;  %v32_v20 = vld [vmem:[%s2938_s0 + $0x68] sm:$0xff]  ;;  %p2332_p0 = scmp.ne.s32.totalorder %s2942_s4, %s2331_s26  ;;  %p2335_p1 = scmp.lt.u32.totalorder %s2331_s26, %s2942_s4 }
  0x1a   :  { %2125 = vmatmul.mubr.msk.f32.gmra.mrb[6].mxu0 %vm92_vm0, %v26_v14  ;;  %v33_v21 = vld [vmem:[%s2938_s0 + $0x70] sm:$0xff]  ;;  %v34_v22 = vld [vmem:[%s2938_s0 + $0x78] sm:$0xff]  ;;  %v35_v23 = vld [vmem:[%s2938_s0 + $0x80] sm:$0xff]  ;;  %v2646_v11 = vshrl.u32 %v88_v10, 7 }
  0x1b   :  { %2127 = vmatprep.mubr.msk.f32.mxu0 %vm92_vm0, %v27_v15  ;;  %v36_v24 = vld [vmem:[%s2938_s0 + $0x88] sm:$0xff]  ;;  %v37_v25 = vld [vmem:[%s2938_s0 + $0x90] sm:$0xff]  ;;  %v38_v26 = vld [vmem:[%s2938_s0 + $0x98] sm:$0xff]  ;;  %p2337_p2 = pnand %p2335_p1, %p2332_p0 }
  0x1c   :  { %v39_v27 = vld [vmem:[%s2938_s0 + $0xa0] sm:$0xff]  ;;  %v40_v28 = vld [vmem:[%s2938_s0 + $0xa8] sm:$0xff]  ;;  %v41_v29 = vld [vmem:[%s2938_s0 + $0xb0] sm:$0xff]  ;;  %v90_v12 = vsub.s32 0, %v2646_v11 }
  0x1d   :  { %v42_v30 = vld [vmem:[%s2938_s0 + $0xb8] sm:$0xff]  ;;  %v43_v31 = vld [vmem:[%s2938_s0 + $0xc0] sm:$0xff]  ;;  %v44_v32 = vld [vmem:[%s2938_s0 + $0xc8] sm:$0xff] }
  0x1e   :  { %2128 = vmatmul.mubr.msk.f32.gmra.mrb[8].mxu0 %vm92_vm0, %v28_v16  ;;  %v45_v33 = vld [vmem:[%s2938_s0 + $0xd0] sm:$0xff]  ;;  %v46_v34 = vld [vmem:[%s2938_s0 + $0xd8] sm:$0xff]  ;;  %v47_v35 = vld [vmem:[%s2938_s0 + $0xe0] sm:$0xff] }
  0x1f   :  { %2130 = vmatprep.mubr.msk.f32.mxu0 %vm92_vm0, %v29_v17  ;;  %v48_v36 = vld [vmem:[%s2938_s0 + $0xe8] sm:$0xff]  ;;  %v49_v37 = vld [vmem:[%s2938_s0 + $0xf0] sm:$0xff]  ;;  %v50_v38 = vld [vmem:[%s2938_s0 + $0xf8] sm:$0xff] }
  0x20   :  { %v51_v39 = vld [vmem:[%s2938_s0 + $0x100] sm:$0xff]  ;;  %v52_v40 = vld [vmem:[%s2938_s0 + $0x108] sm:$0xff]  ;;  %v53_v41 = vld [vmem:[%s2938_s0 + $0x110] sm:$0xff] }
  0x21   :  { %v54_v42 = vld [vmem:[%s2938_s0 + $0x118] sm:$0xff]  ;;  %v55_v43 = vld [vmem:[%s2938_s0 + $0x120] sm:$0xff]  ;;  %v56_v44 = vld [vmem:[%s2938_s0 + $0x128] sm:$0xff] }
  0x22   :  { %2131 = vmatmul.mubr.msk.f32.gmra.mrb[10].mxu0 %vm92_vm0, %v30_v18  ;;  %v57_v45 = vld [vmem:[%s2938_s0 + $0x130] sm:$0xff]  ;;  %v58_v46 = vld [vmem:[%s2938_s0 + $0x138] sm:$0xff]  ;;  %v59_v47 = vld [vmem:[%s2938_s0 + $0x140] sm:$0xff] }
  0x23   :  { %2133 = vmatprep.mubr.msk.f32.mxu0 %vm92_vm0, %v31_v19  ;;  %v60_v48 = vld [vmem:[%s2938_s0 + $0x148] sm:$0xff]  ;;  %v61_v49 = vld [vmem:[%s2938_s0 + $0x150] sm:$0xff]  ;;  %v62_v50 = vld [vmem:[%s2938_s0 + $0x158] sm:$0xff] }
  0x24   :  { %v63_v51 = vld [vmem:[%s2938_s0 + $0x160] sm:$0xff]  ;;  %v867_v53 = vld [vmem:[%s2940_s2 + $0x8] sm:$0xff]  ;;  %v65_v56 = vld [vmem:[%s2938_s0 + $0x170] sm:$0xff] }
  0x25   :  { %v866_v52 = vld [vmem:[%s2940_s2] sm:$0xff]  ;;  %v64_v54 = vld [vmem:[%s2938_s0 + $0x168] sm:$0xff]  ;;  %v66_v57 = vld [vmem:[%s2938_s0 + $0x178] sm:$0xff] }
  0x26   :  { %2134 = vmatmul.mubr.msk.f32.gmra.mrb[12].mxu0 %vm92_vm0, %v32_v20  ;;  %v2319_v55 = vpack.c.bf16 %v867_v53, %v866_v52  ;;  %v67_v58 = vld [vmem:[%s2938_s0 + $0x180] sm:$0xff]  ;;  %v68_v59 = vld [vmem:[%s2938_s0 + $0x188] sm:$0xff]  ;;  %v69_v60 = vld [vmem:[%s2938_s0 + $0x190] sm:$0xff] }
  0x27   :  { %2136 = vmatprep.mubr.msk.f32.mxu0 %vm92_vm0, %v33_v21  ;;  %v70_v61 = vld [vmem:[%s2938_s0 + $0x198] sm:$0xff]  ;;  %v71_v62 = vld [vmem:[%s2938_s0 + $0x1a0] sm:$0xff]  ;;  %v72_v63 = vld [vmem:[%s2938_s0 + $0x1a8] sm:$0xff] }
  0x28   :  { %2320 = vmatprep.subr.bf16.mxu1 %v2319_v55  ;;  %v73_v0 = vld [vmem:[%s2938_s0 + $0x1b0] sm:$0xff]  ;;  %v74_v1 = vld [vmem:[%s2938_s0 + $0x1b8] sm:$0xff]  ;;  %v75_v2 = vld [vmem:[%s2938_s0 + $0x1c0] sm:$0xff] }
  0x29   :  { %2322 = vmatpush3.bf16.msra.mxu1 %v2319_v55  ;;  %v76_v3 = vld [vmem:[%s2938_s0 + $0x1c8] sm:$0xff]  ;;  %v77_v4 = vld [vmem:[%s2938_s0 + $0x1d0] sm:$0xff]  ;;  %v78_v5 = vld [vmem:[%s2938_s0 + $0x1d8] sm:$0xff] }
  0x2a   :  { %2137 = vmatmul.mubr.msk.f32.gmra.mrb[14].mxu0 %vm92_vm0, %v34_v22  ;;  %v79_v6 = vld [vmem:[%s2938_s0 + $0x1e0] sm:$0xff]  ;;  %v80_v7 = vld [vmem:[%s2938_s0 + $0x1e8] sm:$0xff]  ;;  %v81_v8 = vld [vmem:[%s2938_s0 + $0x1f0] sm:$0xff] }
  0x2b   :  { %2139 = vmatprep.mubr.msk.f32.mxu0 %vm92_vm0, %v35_v23  ;;  %v82_v9 = vld [vmem:[%s2938_s0 + $0x1f8] sm:$0xff]  ;;  %v2652_v13 = vld [vmem:[%s2941_s3] sm:$0xf] }
  0x2c   :  { %v2655_v14 = vrot.slane %v2652_v13, %v90_v12 }
  0x2e   :  { %2140 = vmatmul.mubr.msk.f32.gmra.mrb[16].mxu0 %vm92_vm0, %v36_v24 }
  0x2f   :  { %2142 = vmatprep.mubr.msk.f32.mxu0 %vm92_vm0, %v37_v25 }
  0x32   :  { %2143 = vmatmul.mubr.msk.f32.gmra.mrb[18].mxu0 %vm92_vm0, %v38_v26 }
  0x33   :  { %2145 = vmatprep.mubr.msk.f32.mxu0 %vm92_vm0, %v39_v27 }
  0x36   :  { %2146 = vmatmul.mubr.msk.f32.gmra.mrb[20].mxu0 %vm92_vm0, %v40_v28 }
  0x37   :  { %2148 = vmatprep.mubr.msk.f32.mxu0 %vm92_vm0, %v41_v29 }
  0x3a   :  { %2149 = vmatmul.mubr.msk.f32.gmra.mrb[22].mxu0 %vm92_vm0, %v42_v30 }
  0x3b   :  { %2151 = vmatprep.mubr.msk.f32.mxu0 %vm92_vm0, %v43_v31 }
  0x3e   :  { %2152 = vmatmul.mubr.msk.f32.gmra.mrb[24].mxu0 %vm92_vm0, %v44_v32 }
  0x3f   :  { %2154 = vmatprep.mubr.msk.f32.mxu0 %vm92_vm0, %v45_v33 }
  0x42   :  { %2155 = vmatmul.mubr.msk.f32.gmra.mrb[26].mxu0 %vm92_vm0, %v46_v34 }
  0x43   :  { %2157 = vmatprep.mubr.msk.f32.mxu0 %vm92_vm0, %v47_v35 }
  0x46   :  { %2158 = vmatmul.mubr.msk.f32.gmra.mrb[28].mxu0 %vm92_vm0, %v48_v36 }
  0x47   :  { %2160 = vmatprep.mubr.msk.f32.mxu0 %vm92_vm0, %v49_v37 }
  0x4a   :  { %2161 = vmatmul.mubr.msk.f32.gmra.mrb[30].mxu0 %vm92_vm0, %v50_v38 }
  0x4b   :  { %2163 = vmatprep.mubr.msk.f32.mxu0 %vm92_vm0, %v51_v39 }
  0x4e   :  { %2164 = vmatmul.mubr.msk.f32.gmra.mrb[32].mxu0 %vm92_vm0, %v52_v40 }
  0x4f   :  { %2166 = vmatprep.mubr.msk.f32.mxu0 %vm92_vm0, %v53_v41 }
  0x52   :  { %2167 = vmatmul.mubr.msk.f32.gmra.mrb[34].mxu0 %vm92_vm0, %v54_v42 }
  0x53   :  { %2169 = vmatprep.mubr.msk.f32.mxu0 %vm92_vm0, %v55_v43 }
  0x56   :  { %2170 = vmatmul.mubr.msk.f32.gmra.mrb[36].mxu0 %vm92_vm0, %v56_v44 }
  0x57   :  { %2172 = vmatprep.mubr.msk.f32.mxu0 %vm92_vm0, %v57_v45 }
  0x5a   :  { %2173 = vmatmul.mubr.msk.f32.gmra.mrb[38].mxu0 %vm92_vm0, %v58_v46 }
  0x5b   :  { %2175 = vmatprep.mubr.msk.f32.mxu0 %vm92_vm0, %v59_v47 }
  0x5e   :  { %2176 = vmatmul.mubr.msk.f32.gmra.mrb[40].mxu0 %vm92_vm0, %v60_v48 }
  0x5f   :  { %2178 = vmatprep.mubr.msk.f32.mxu0 %vm92_vm0, %v61_v49 }
  0x62   :  { %2179 = vmatmul.mubr.msk.f32.gmra.mrb[42].mxu0 %vm92_vm0, %v62_v50 }
  0x63   :  { %2181 = vmatprep.mubr.msk.f32.mxu0 %vm92_vm0, %v63_v51 }
  0x66   :  { %2182 = vmatmul.mubr.msk.f32.gmra.mrb[44].mxu0 %vm92_vm0, %v64_v54 }
  0x67   :  { %2184 = vmatprep.mubr.msk.f32.mxu0 %vm92_vm0, %v65_v56 }
  0x6a   :  { %2185 = vmatmul.mubr.msk.f32.gmra.mrb[46].mxu0 %vm92_vm0, %v66_v57 }
  0x6b   :  { %2187 = vmatprep.mubr.msk.f32.mxu0 %vm92_vm0, %v67_v58 }
  0x6e   :  { %2188 = vmatmul.mubr.msk.f32.gmra.mrb[48].mxu0 %vm92_vm0, %v68_v59 }
  0x6f   :  { %2190 = vmatprep.mubr.msk.f32.mxu0 %vm92_vm0, %v69_v60 }
  0x72   :  { %2191 = vmatmul.mubr.msk.f32.gmra.mrb[50].mxu0 %vm92_vm0, %v70_v61 }
  0x73   :  { %2193 = vmatprep.mubr.msk.f32.mxu0 %vm92_vm0, %v71_v62 }
  0x76   :  { %2194 = vmatmul.mubr.msk.f32.gmra.mrb[52].mxu0 %vm92_vm0, %v72_v63 }
  0x77   :  { %2196 = vmatprep.mubr.msk.f32.mxu0 %vm92_vm0, %v73_v0 }
  0x7a   :  { %2197 = vmatmul.mubr.msk.f32.gmra.mrb[54].mxu0 %vm92_vm0, %v74_v1 }
  0x7b   :  { %2199 = vmatprep.mubr.msk.f32.mxu0 %vm92_vm0, %v75_v2 }
  0x7e   :  { %2200 = vmatmul.mubr.msk.f32.gmra.mrb[56].mxu0 %vm92_vm0, %v76_v3 }
  0x7f   :  { %2202 = vmatprep.mubr.msk.f32.mxu0 %vm92_vm0, %v77_v4 }
  0x82   :  { %2203 = vmatmul.mubr.msk.f32.gmra.mrb[58].mxu0 %vm92_vm0, %v78_v5 }
  0x83   :  { %2205 = vmatprep.mubr.msk.f32.mxu0 %vm92_vm0, %v79_v6 }
  0x86   :  { %2206 = vmatmul.mubr.msk.f32.gmra.mrb[60].mxu0 %vm92_vm0, %v80_v7 }
  0x87   :  { %2208 = vmatprep.mubr.msk.f32.mxu0 %vm92_vm0, %v81_v8 }
  0x8a   :  { %2209 = vmatmul.mubr.msk.f32.gmra.mrb[62].mxu0 %vm92_vm0, %v82_v9 }
  0xe1   :  { %v2117_v15 = vpop.f32.mrb[0].mxu0 }
  0xe2   :  { %v361_v16 = vadd.f32 %v2117_v15, %v2655_v14  ;;  %v355_v17 = vpop.f32.mrb[1].mxu0 }
  0xe3   :  { %v356_v18 = vadd.f32 %v355_v17, %v2655_v14 }
  0xe4   :  { %v739_v19 = vmul.f32 0.2, %v361_v16  ;;  %vm675_vm2 = vcmp.gt.f32.partialorder %v361_v16, 0.0 }
  0xe5   :  { %v2120_v20 = vpop.f32.mrb[2].mxu0  ;;  %vm674_vm3 = vcmp.gt.f32.partialorder %v356_v18, 0.0  ;;  %v738_v21 = vmul.f32 0.2, %v356_v18 }
  0xe6   :  { %v371_v22 = vadd.f32 %v2120_v20, %v2655_v14  ;;  %v365_v23 = vpop.f32.mrb[3].mxu0  ;;  %v803_v27 = vsel %vm675_vm2, %v361_v16, %v739_v19 }
  0xe7   :  { %v366_v24 = vadd.f32 %v365_v23, %v2655_v14  ;;  %v802_v25 = vsel %vm674_vm3, %v356_v18, %v738_v21 }
  0xe8   :  { %v741_v26 = vmul.f32 0.2, %v371_v22  ;;  %2215 = vmatprep.mubr.msk.f32.mxu1 %vm872_vm4, %v802_v25  ;;  %vm677_vm5 = vcmp.gt.f32.partialorder %v371_v22, 0.0 }
  0xe9   :  { %vm676_vm6 = vcmp.gt.f32.partialorder %v366_v24, 0.0  ;;  %v740_v28 = vmul.f32 0.2, %v366_v24  ;;  %v2123_v29 = vpop.f32.mrb[4].mxu0  ;;  %2216 = vmatmul.mubr.msk.f32.vlgmr.msra.gmra.mrb[0].mxu1 %vm872_vm4, %v803_v27 }
  0xea   :  { %v381_v30 = vadd.f32 %v2123_v29, %v2655_v14  ;;  %v375_v31 = vpop.f32.mrb[5].mxu0  ;;  %v805_v35 = vsel %vm677_vm5, %v371_v22, %v741_v26 }
  0xeb   :  { %v376_v32 = vadd.f32 %v375_v31, %v2655_v14  ;;  %v804_v33 = vsel %vm676_vm6, %v366_v24, %v740_v28 }
  0xec   :  { %v743_v34 = vmul.f32 0.2, %v381_v30  ;;  %2218 = vmatprep.mubr.msk.f32.mxu1 %vm872_vm4, %v804_v33  ;;  %vm679_vm7 = vcmp.gt.f32.partialorder %v381_v30, 0.0 }
  0xed   :  { %vm678_vm8 = vcmp.gt.f32.partialorder %v376_v32, 0.0  ;;  %v742_v36 = vmul.f32 0.2, %v376_v32  ;;  %v2126_v37 = vpop.f32.mrb[6].mxu0  ;;  %2219 = vmatmul.mubr.msk.f32.gmra.mrb[2].mxu1 %vm872_vm4, %v805_v35 }
  0xee   :  { %v391_v38 = vadd.f32 %v2126_v37, %v2655_v14  ;;  %v385_v39 = vpop.f32.mrb[7].mxu0  ;;  %v807_v43 = vsel %vm679_vm7, %v381_v30, %v743_v34 }
  0xef   :  { %v386_v40 = vadd.f32 %v385_v39, %v2655_v14  ;;  %v806_v41 = vsel %vm678_vm8, %v376_v32, %v742_v36 }
  0xf0   :  { %v745_v42 = vmul.f32 0.2, %v391_v38  ;;  %2221 = vmatprep.mubr.msk.f32.mxu1 %vm872_vm4, %v806_v41  ;;  %vm681_vm9 = vcmp.gt.f32.partialorder %v391_v38, 0.0 }
  0xf1   :  { %vm680_vm10 = vcmp.gt.f32.partialorder %v386_v40, 0.0  ;;  %v744_v44 = vmul.f32 0.2, %v386_v40  ;;  %v2129_v45 = vpop.f32.mrb[8].mxu0  ;;  %2222 = vmatmul.mubr.msk.f32.gmra.mrb[4].mxu1 %vm872_vm4, %v807_v43 }
  0xf2   :  { %v401_v46 = vadd.f32 %v2129_v45, %v2655_v14  ;;  %v395_v47 = vpop.f32.mrb[9].mxu0  ;;  %v809_v51 = vsel %vm681_vm9, %v391_v38, %v745_v42 }
  0xf3   :  { %v396_v48 = vadd.f32 %v395_v47, %v2655_v14  ;;  %v808_v49 = vsel %vm680_vm10, %v386_v40, %v744_v44 }
  0xf4   :  { %v747_v50 = vmul.f32 0.2, %v401_v46  ;;  %2224 = vmatprep.mubr.msk.f32.mxu1 %vm872_vm4, %v808_v49  ;;  %vm683_vm11 = vcmp.gt.f32.partialorder %v401_v46, 0.0 }
  0xf5   :  { %vm682_vm12 = vcmp.gt.f32.partialorder %v396_v48, 0.0  ;;  %v746_v52 = vmul.f32 0.2, %v396_v48  ;;  %v2132_v53 = vpop.f32.mrb[10].mxu0  ;;  %2225 = vmatmul.mubr.msk.f32.gmra.mrb[6].mxu1 %vm872_vm4, %v809_v51 }
  0xf6   :  { %v411_v54 = vadd.f32 %v2132_v53, %v2655_v14  ;;  %v405_v55 = vpop.f32.mrb[11].mxu0  ;;  %v811_v59 = vsel %vm683_vm11, %v401_v46, %v747_v50 }
  0xf7   :  { %v406_v56 = vadd.f32 %v405_v55, %v2655_v14  ;;  %v810_v57 = vsel %vm682_vm12, %v396_v48, %v746_v52 }
  0xf8   :  { %v749_v58 = vmul.f32 0.2, %v411_v54  ;;  %2227 = vmatprep.mubr.msk.f32.mxu1 %vm872_vm4, %v810_v57  ;;  %vm685_vm13 = vcmp.gt.f32.partialorder %v411_v54, 0.0 }
  0xf9   :  { %vm684_vm14 = vcmp.gt.f32.partialorder %v406_v56, 0.0  ;;  %v748_v60 = vmul.f32 0.2, %v406_v56  ;;  %v2135_v61 = vpop.f32.mrb[12].mxu0  ;;  %2228 = vmatmul.mubr.msk.f32.gmra.mrb[8].mxu1 %vm872_vm4, %v811_v59 }
  0xfa   :  { %v421_v62 = vadd.f32 %v2135_v61, %v2655_v14  ;;  %v415_v63 = vpop.f32.mrb[13].mxu0  ;;  %v813_v3 = vsel %vm685_vm13, %v411_v54, %v749_v58 }
  0xfb   :  { %v416_v0 = vadd.f32 %v415_v63, %v2655_v14  ;;  %v812_v1 = vsel %vm684_vm14, %v406_v56, %v748_v60 }
  0xfc   :  { %v751_v2 = vmul.f32 0.2, %v421_v62  ;;  %2230 = vmatprep.mubr.msk.f32.mxu1 %vm872_vm4, %v812_v1  ;;  %vm687_vm15 = vcmp.gt.f32.partialorder %v421_v62, 0.0 }
  0xfd   :  { %vm686_vm0 = vcmp.gt.f32.partialorder %v416_v0, 0.0  ;;  %v750_v4 = vmul.f32 0.2, %v416_v0  ;;  %v2138_v5 = vpop.f32.mrb[14].mxu0  ;;  %2231 = vmatmul.mubr.msk.f32.gmra.mrb[10].mxu1 %vm872_vm4, %v813_v3 }
  0xfe   :  { %v431_v6 = vadd.f32 %v2138_v5, %v2655_v14  ;;  %v425_v7 = vpop.f32.mrb[15].mxu0  ;;  %v815_v12 = vsel %vm687_vm15, %v421_v62, %v751_v2 }
  0xff   :  { %v426_v8 = vadd.f32 %v425_v7, %v2655_v14  ;;  %v814_v9 = vsel %vm686_vm0, %v416_v0, %v750_v4 }
 0x100   :  { %v753_v10 = vmul.f32 0.2, %v431_v6  ;;  %2233 = vmatprep.mubr.msk.f32.mxu1 %vm872_vm4, %v814_v9  ;;  %vm689_vm1 = vcmp.gt.f32.partialorder %v431_v6, 0.0 }
 0x101   :  { %vm688_vm2 = vcmp.gt.f32.partialorder %v426_v8, 0.0  ;;  %v752_v15 = vmul.f32 0.2, %v426_v8  ;;  %v2141_v16 = vpop.f32.mrb[16].mxu0  ;;  %2234 = vmatmul.mubr.msk.f32.gmra.mrb[12].mxu1 %vm872_vm4, %v815_v12 }
 0x102   :  { %v441_v17 = vadd.f32 %v2141_v16, %v2655_v14  ;;  %v435_v18 = vpop.f32.mrb[17].mxu0  ;;  %v817_v22 = vsel %vm689_vm1, %v431_v6, %v753_v10 }
 0x103   :  { %v436_v19 = vadd.f32 %v435_v18, %v2655_v14  ;;  %v816_v20 = vsel %vm688_vm2, %v426_v8, %v752_v15 }
 0x104   :  { %v755_v21 = vmul.f32 0.2, %v441_v17  ;;  %2236 = vmatprep.mubr.msk.f32.mxu1 %vm872_vm4, %v816_v20  ;;  %vm691_vm3 = vcmp.gt.f32.partialorder %v441_v17, 0.0 }
 0x105   :  { %vm690_vm5 = vcmp.gt.f32.partialorder %v436_v19, 0.0  ;;  %v754_v23 = vmul.f32 0.2, %v436_v19  ;;  %v2144_v24 = vpop.f32.mrb[18].mxu0  ;;  %2237 = vmatmul.mubr.msk.f32.gmra.mrb[14].mxu1 %vm872_vm4, %v817_v22 }
 0x106   :  { %v451_v25 = vadd.f32 %v2144_v24, %v2655_v14  ;;  %v445_v26 = vpop.f32.mrb[19].mxu0  ;;  %v819_v30 = vsel %vm691_vm3, %v441_v17, %v755_v21 }
 0x107   :  { %v446_v27 = vadd.f32 %v445_v26, %v2655_v14  ;;  %v818_v28 = vsel %vm690_vm5, %v436_v19, %v754_v23 }
 0x108   :  { %v757_v29 = vmul.f32 0.2, %v451_v25  ;;  %2239 = vmatprep.mubr.msk.f32.mxu1 %vm872_vm4, %v818_v28  ;;  %vm693_vm6 = vcmp.gt.f32.partialorder %v451_v25, 0.0 }
 0x109   :  { %vm692_vm7 = vcmp.gt.f32.partialorder %v446_v27, 0.0  ;;  %v756_v31 = vmul.f32 0.2, %v446_v27  ;;  %v2147_v32 = vpop.f32.mrb[20].mxu0  ;;  %2240 = vmatmul.mubr.msk.f32.gmra.mrb[16].mxu1 %vm872_vm4, %v819_v30 }
 0x10a   :  { %v461_v33 = vadd.f32 %v2147_v32, %v2655_v14  ;;  %v455_v34 = vpop.f32.mrb[21].mxu0  ;;  %v821_v38 = vsel %vm693_vm6, %v451_v25, %v757_v29 }
 0x10b   :  { %v456_v35 = vadd.f32 %v455_v34, %v2655_v14  ;;  %v820_v36 = vsel %vm692_vm7, %v446_v27, %v756_v31 }
 0x10c   :  { %v759_v37 = vmul.f32 0.2, %v461_v33  ;;  %2242 = vmatprep.mubr.msk.f32.mxu1 %vm872_vm4, %v820_v36  ;;  %vm695_vm8 = vcmp.gt.f32.partialorder %v461_v33, 0.0 }
 0x10d   :  { %vm694_vm9 = vcmp.gt.f32.partialorder %v456_v35, 0.0  ;;  %v758_v39 = vmul.f32 0.2, %v456_v35  ;;  %v2150_v40 = vpop.f32.mrb[22].mxu0  ;;  %2243 = vmatmul.mubr.msk.f32.gmra.mrb[18].mxu1 %vm872_vm4, %v821_v38 }
 0x10e   :  { %v471_v41 = vadd.f32 %v2150_v40, %v2655_v14  ;;  %v465_v42 = vpop.f32.mrb[23].mxu0  ;;  %v823_v46 = vsel %vm695_vm8, %v461_v33, %v759_v37 }
 0x10f   :  { %v466_v43 = vadd.f32 %v465_v42, %v2655_v14  ;;  %v822_v44 = vsel %vm694_vm9, %v456_v35, %v758_v39 }
 0x110   :  { %v761_v45 = vmul.f32 0.2, %v471_v41  ;;  %2245 = vmatprep.mubr.msk.f32.mxu1 %vm872_vm4, %v822_v44  ;;  %vm697_vm10 = vcmp.gt.f32.partialorder %v471_v41, 0.0 }
 0x111   :  { %vm696_vm11 = vcmp.gt.f32.partialorder %v466_v43, 0.0  ;;  %v760_v47 = vmul.f32 0.2, %v466_v43  ;;  %v2153_v48 = vpop.f32.mrb[24].mxu0  ;;  %2246 = vmatmul.mubr.msk.f32.gmra.mrb[20].mxu1 %vm872_vm4, %v823_v46 }
 0x112   :  { %v481_v49 = vadd.f32 %v2153_v48, %v2655_v14  ;;  %v475_v50 = vpop.f32.mrb[25].mxu0  ;;  %v825_v54 = vsel %vm697_vm10, %v471_v41, %v761_v45 }
 0x113   :  { %v476_v51 = vadd.f32 %v475_v50, %v2655_v14  ;;  %v824_v52 = vsel %vm696_vm11, %v466_v43, %v760_v47 }
 0x114   :  { %v763_v53 = vmul.f32 0.2, %v481_v49  ;;  %2248 = vmatprep.mubr.msk.f32.mxu1 %vm872_vm4, %v824_v52  ;;  %vm699_vm12 = vcmp.gt.f32.partialorder %v481_v49, 0.0 }
 0x115   :  { %vm698_vm13 = vcmp.gt.f32.partialorder %v476_v51, 0.0  ;;  %v762_v55 = vmul.f32 0.2, %v476_v51  ;;  %v2156_v56 = vpop.f32.mrb[26].mxu0  ;;  %2249 = vmatmul.mubr.msk.f32.gmra.mrb[22].mxu1 %vm872_vm4, %v825_v54 }
 0x116   :  { %v491_v57 = vadd.f32 %v2156_v56, %v2655_v14  ;;  %v485_v58 = vpop.f32.mrb[27].mxu0  ;;  %v827_v62 = vsel %vm699_vm12, %v481_v49, %v763_v53 }
 0x117   :  { %v486_v59 = vadd.f32 %v485_v58, %v2655_v14  ;;  %v826_v60 = vsel %vm698_vm13, %v476_v51, %v762_v55 }
 0x118   :  { %v765_v61 = vmul.f32 0.2, %v491_v57  ;;  %2251 = vmatprep.mubr.msk.f32.mxu1 %vm872_vm4, %v826_v60  ;;  %vm701_vm14 = vcmp.gt.f32.partialorder %v491_v57, 0.0 }
 0x119   :  { %vm700_vm15 = vcmp.gt.f32.partialorder %v486_v59, 0.0  ;;  %v764_v63 = vmul.f32 0.2, %v486_v59  ;;  %v2159_v0 = vpop.f32.mrb[28].mxu0  ;;  %2252 = vmatmul.mubr.msk.f32.gmra.mrb[24].mxu1 %vm872_vm4, %v827_v62 }
 0x11a   :  { %v501_v1 = vadd.f32 %v2159_v0, %v2655_v14  ;;  %v495_v2 = vpop.f32.mrb[29].mxu0  ;;  %v829_v6 = vsel %vm701_vm14, %v491_v57, %v765_v61 }
 0x11b   :  { %v496_v3 = vadd.f32 %v495_v2, %v2655_v14  ;;  %v828_v4 = vsel %vm700_vm15, %v486_v59, %v764_v63 }
 0x11c   :  { %v767_v5 = vmul.f32 0.2, %v501_v1  ;;  %2254 = vmatprep.mubr.msk.f32.mxu1 %vm872_vm4, %v828_v4  ;;  %vm703_vm0 = vcmp.gt.f32.partialorder %v501_v1, 0.0 }
 0x11d   :  { %vm702_vm1 = vcmp.gt.f32.partialorder %v496_v3, 0.0  ;;  %v766_v7 = vmul.f32 0.2, %v496_v3  ;;  %v2162_v8 = vpop.f32.mrb[30].mxu0  ;;  %2255 = vmatmul.mubr.msk.f32.gmra.mrb[26].mxu1 %vm872_vm4, %v829_v6 }
 0x11e   :  { %v511_v9 = vadd.f32 %v2162_v8, %v2655_v14  ;;  %v505_v10 = vpop.f32.mrb[31].mxu0  ;;  %v831_v17 = vsel %vm703_vm0, %v501_v1, %v767_v5 }
 0x11f   :  { %v506_v12 = vadd.f32 %v505_v10, %v2655_v14  ;;  %v830_v15 = vsel %vm702_vm1, %v496_v3, %v766_v7 }
 0x120   :  { %v769_v16 = vmul.f32 0.2, %v511_v9  ;;  %2257 = vmatprep.mubr.msk.f32.mxu1 %vm872_vm4, %v830_v15  ;;  %vm705_vm2 = vcmp.gt.f32.partialorder %v511_v9, 0.0 }
 0x121   :  { %vm704_vm3 = vcmp.gt.f32.partialorder %v506_v12, 0.0  ;;  %v768_v18 = vmul.f32 0.2, %v506_v12  ;;  %v2165_v19 = vpop.f32.mrb[32].mxu0  ;;  %2258 = vmatmul.mubr.msk.f32.gmra.mrb[28].mxu1 %vm872_vm4, %v831_v17 }
 0x122   :  { %v521_v20 = vadd.f32 %v2165_v19, %v2655_v14  ;;  %v515_v21 = vpop.f32.mrb[33].mxu0  ;;  %v833_v25 = vsel %vm705_vm2, %v511_v9, %v769_v16 }
 0x123   :  { %v516_v22 = vadd.f32 %v515_v21, %v2655_v14  ;;  %v832_v23 = vsel %vm704_vm3, %v506_v12, %v768_v18 }
 0x124   :  { %v771_v24 = vmul.f32 0.2, %v521_v20  ;;  %2260 = vmatprep.mubr.msk.f32.mxu1 %vm872_vm4, %v832_v23  ;;  %vm707_vm5 = vcmp.gt.f32.partialorder %v521_v20, 0.0 }
 0x125   :  { %vm706_vm6 = vcmp.gt.f32.partialorder %v516_v22, 0.0  ;;  %v770_v26 = vmul.f32 0.2, %v516_v22  ;;  %v2168_v27 = vpop.f32.mrb[34].mxu0  ;;  %2261 = vmatmul.mubr.msk.f32.gmra.mrb[30].mxu1 %vm872_vm4, %v833_v25 }
 0x126   :  { %v531_v28 = vadd.f32 %v2168_v27, %v2655_v14  ;;  %v525_v29 = vpop.f32.mrb[35].mxu0  ;;  %v835_v33 = vsel %vm707_vm5, %v521_v20, %v771_v24 }
 0x127   :  { %v526_v30 = vadd.f32 %v525_v29, %v2655_v14  ;;  %v834_v31 = vsel %vm706_vm6, %v516_v22, %v770_v26 }
 0x128   :  { %v773_v32 = vmul.f32 0.2, %v531_v28  ;;  %2263 = vmatprep.mubr.msk.f32.mxu1 %vm872_vm4, %v834_v31  ;;  %vm709_vm7 = vcmp.gt.f32.partialorder %v531_v28, 0.0 }
 0x129   :  { %vm708_vm8 = vcmp.gt.f32.partialorder %v526_v30, 0.0  ;;  %v772_v34 = vmul.f32 0.2, %v526_v30  ;;  %v2171_v35 = vpop.f32.mrb[36].mxu0  ;;  %2264 = vmatmul.mubr.msk.f32.gmra.mrb[32].mxu1 %vm872_vm4, %v835_v33 }
 0x12a   :  { %v541_v36 = vadd.f32 %v2171_v35, %v2655_v14  ;;  %v535_v37 = vpop.f32.mrb[37].mxu0  ;;  %v837_v41 = vsel %vm709_vm7, %v531_v28, %v773_v32 }
 0x12b   :  { %v536_v38 = vadd.f32 %v535_v37, %v2655_v14  ;;  %v836_v39 = vsel %vm708_vm8, %v526_v30, %v772_v34 }
 0x12c   :  { %v775_v40 = vmul.f32 0.2, %v541_v36  ;;  %2266 = vmatprep.mubr.msk.f32.mxu1 %vm872_vm4, %v836_v39  ;;  %vm711_vm9 = vcmp.gt.f32.partialorder %v541_v36, 0.0 }
 0x12d   :  { %vm710_vm10 = vcmp.gt.f32.partialorder %v536_v38, 0.0  ;;  %v774_v42 = vmul.f32 0.2, %v536_v38  ;;  %v2174_v43 = vpop.f32.mrb[38].mxu0  ;;  %2267 = vmatmul.mubr.msk.f32.gmra.mrb[34].mxu1 %vm872_vm4, %v837_v41 }
 0x12e   :  { %v551_v44 = vadd.f32 %v2174_v43, %v2655_v14  ;;  %v545_v45 = vpop.f32.mrb[39].mxu0  ;;  %v839_v49 = vsel %vm711_vm9, %v541_v36, %v775_v40 }
 0x12f   :  { %v546_v46 = vadd.f32 %v545_v45, %v2655_v14  ;;  %v838_v47 = vsel %vm710_vm10, %v536_v38, %v774_v42 }
 0x130   :  { %v777_v48 = vmul.f32 0.2, %v551_v44  ;;  %2269 = vmatprep.mubr.msk.f32.mxu1 %vm872_vm4, %v838_v47  ;;  %vm713_vm11 = vcmp.gt.f32.partialorder %v551_v44, 0.0 }
 0x131   :  { %vm712_vm12 = vcmp.gt.f32.partialorder %v546_v46, 0.0  ;;  %v776_v50 = vmul.f32 0.2, %v546_v46  ;;  %v2177_v51 = vpop.f32.mrb[40].mxu0  ;;  %2270 = vmatmul.mubr.msk.f32.gmra.mrb[36].mxu1 %vm872_vm4, %v839_v49 }
 0x132   :  { %v561_v52 = vadd.f32 %v2177_v51, %v2655_v14  ;;  %v555_v53 = vpop.f32.mrb[41].mxu0  ;;  %v841_v57 = vsel %vm713_vm11, %v551_v44, %v777_v48 }
 0x133   :  { %v556_v54 = vadd.f32 %v555_v53, %v2655_v14  ;;  %v840_v55 = vsel %vm712_vm12, %v546_v46, %v776_v50 }
 0x134   :  { %v779_v56 = vmul.f32 0.2, %v561_v52  ;;  %2272 = vmatprep.mubr.msk.f32.mxu1 %vm872_vm4, %v840_v55  ;;  %vm715_vm13 = vcmp.gt.f32.partialorder %v561_v52, 0.0 }
 0x135   :  { %vm714_vm14 = vcmp.gt.f32.partialorder %v556_v54, 0.0  ;;  %v778_v58 = vmul.f32 0.2, %v556_v54  ;;  %v2180_v59 = vpop.f32.mrb[42].mxu0  ;;  %2273 = vmatmul.mubr.msk.f32.gmra.mrb[38].mxu1 %vm872_vm4, %v841_v57 }
 0x136   :  { %v571_v60 = vadd.f32 %v2180_v59, %v2655_v14  ;;  %v565_v61 = vpop.f32.mrb[43].mxu0  ;;  %v843_v1 = vsel %vm715_vm13, %v561_v52, %v779_v56 }
 0x137   :  { %v566_v62 = vadd.f32 %v565_v61, %v2655_v14  ;;  %v842_v63 = vsel %vm714_vm14, %v556_v54, %v778_v58 }
 0x138   :  { %v781_v0 = vmul.f32 0.2, %v571_v60  ;;  %2275 = vmatprep.mubr.msk.f32.mxu1 %vm872_vm4, %v842_v63  ;;  %vm717_vm15 = vcmp.gt.f32.partialorder %v571_v60, 0.0 }
 0x139   :  { %vm716_vm0 = vcmp.gt.f32.partialorder %v566_v62, 0.0  ;;  %v780_v2 = vmul.f32 0.2, %v566_v62  ;;  %v2183_v3 = vpop.f32.mrb[44].mxu0  ;;  %2276 = vmatmul.mubr.msk.f32.gmra.mrb[40].mxu1 %vm872_vm4, %v843_v1 }
 0x13a   :  { %v581_v4 = vadd.f32 %v2183_v3, %v2655_v14  ;;  %v575_v5 = vpop.f32.mrb[45].mxu0  ;;  %v845_v9 = vsel %vm717_vm15, %v571_v60, %v781_v0 }
 0x13b   :  { %v576_v6 = vadd.f32 %v575_v5, %v2655_v14  ;;  %v844_v7 = vsel %vm716_vm0, %v566_v62, %v780_v2 }
 0x13c   :  { %v783_v8 = vmul.f32 0.2, %v581_v4  ;;  %2278 = vmatprep.mubr.msk.f32.mxu1 %vm872_vm4, %v844_v7  ;;  %vm719_vm1 = vcmp.gt.f32.partialorder %v581_v4, 0.0 }
 0x13d   :  { %vm718_vm2 = vcmp.gt.f32.partialorder %v576_v6, 0.0  ;;  %v782_v10 = vmul.f32 0.2, %v576_v6  ;;  %v2186_v12 = vpop.f32.mrb[46].mxu0  ;;  %2279 = vmatmul.mubr.msk.f32.gmra.mrb[42].mxu1 %vm872_vm4, %v845_v9 }
 0x13e   :  { %v591_v15 = vadd.f32 %v2186_v12, %v2655_v14  ;;  %v585_v16 = vpop.f32.mrb[47].mxu0  ;;  %v847_v20 = vsel %vm719_vm1, %v581_v4, %v783_v8 }
 0x13f   :  { %v586_v17 = vadd.f32 %v585_v16, %v2655_v14  ;;  %v846_v18 = vsel %vm718_vm2, %v576_v6, %v782_v10 }
 0x140   :  { %v785_v19 = vmul.f32 0.2, %v591_v15  ;;  %2281 = vmatprep.mubr.msk.f32.mxu1 %vm872_vm4, %v846_v18  ;;  %vm721_vm3 = vcmp.gt.f32.partialorder %v591_v15, 0.0 }
 0x141   :  { %vm720_vm5 = vcmp.gt.f32.partialorder %v586_v17, 0.0  ;;  %v784_v21 = vmul.f32 0.2, %v586_v17  ;;  %v2189_v22 = vpop.f32.mrb[48].mxu0  ;;  %2282 = vmatmul.mubr.msk.f32.gmra.mrb[44].mxu1 %vm872_vm4, %v847_v20 }
 0x142   :  { %v601_v23 = vadd.f32 %v2189_v22, %v2655_v14  ;;  %v595_v24 = vpop.f32.mrb[49].mxu0  ;;  %v849_v28 = vsel %vm721_vm3, %v591_v15, %v785_v19 }
 0x143   :  { %v596_v25 = vadd.f32 %v595_v24, %v2655_v14  ;;  %v848_v26 = vsel %vm720_vm5, %v586_v17, %v784_v21 }
 0x144   :  { %v787_v27 = vmul.f32 0.2, %v601_v23  ;;  %2284 = vmatprep.mubr.msk.f32.mxu1 %vm872_vm4, %v848_v26  ;;  %vm723_vm6 = vcmp.gt.f32.partialorder %v601_v23, 0.0 }
 0x145   :  { %vm722_vm7 = vcmp.gt.f32.partialorder %v596_v25, 0.0  ;;  %v786_v29 = vmul.f32 0.2, %v596_v25  ;;  %v2192_v30 = vpop.f32.mrb[50].mxu0  ;;  %2285 = vmatmul.mubr.msk.f32.gmra.mrb[46].mxu1 %vm872_vm4, %v849_v28 }
 0x146   :  { %v611_v31 = vadd.f32 %v2192_v30, %v2655_v14  ;;  %v605_v32 = vpop.f32.mrb[51].mxu0  ;;  %v851_v36 = vsel %vm723_vm6, %v601_v23, %v787_v27  ;;  %v870_v27 = vsub.s32 1, %v2646_v11 }
 0x147   :  { %v606_v33 = vadd.f32 %v605_v32, %v2655_v14  ;;  %v850_v34 = vsel %vm722_vm7, %v596_v25, %v786_v29 }
 0x148   :  { %v789_v35 = vmul.f32 0.2, %v611_v31  ;;  %2287 = vmatprep.mubr.msk.f32.mxu1 %vm872_vm4, %v850_v34  ;;  %vm725_vm8 = vcmp.gt.f32.partialorder %v611_v31, 0.0 }
 0x149   :  { %vm724_vm9 = vcmp.gt.f32.partialorder %v606_v33, 0.0  ;;  %v788_v37 = vmul.f32 0.2, %v606_v33  ;;  %v2195_v38 = vpop.f32.mrb[52].mxu0  ;;  %2288 = vmatmul.mubr.msk.f32.gmra.mrb[48].mxu1 %vm872_vm4, %v851_v36 }
 0x14a   :  { %v621_v39 = vadd.f32 %v2195_v38, %v2655_v14  ;;  %v615_v40 = vpop.f32.mrb[53].mxu0  ;;  %v853_v44 = vsel %vm725_vm8, %v611_v31, %v789_v35  ;;  %vm1642_vm8 = vcmask 261120  }
 0x14b   :  { %v616_v41 = vadd.f32 %v615_v40, %v2655_v14  ;;  %v852_v42 = vsel %vm724_vm9, %v606_v33, %v788_v37 }
 0x14c   :  { %v791_v43 = vmul.f32 0.2, %v621_v39  ;;  %2290 = vmatprep.mubr.msk.f32.mxu1 %vm872_vm4, %v852_v42  ;;  %vm727_vm10 = vcmp.gt.f32.partialorder %v621_v39, 0.0 }
 0x14d   :  { %vm726_vm11 = vcmp.gt.f32.partialorder %v616_v41, 0.0  ;;  %v790_v45 = vmul.f32 0.2, %v616_v41  ;;  %v2198_v46 = vpop.f32.mrb[54].mxu0  ;;  %2291 = vmatmul.mubr.msk.f32.gmra.mrb[50].mxu1 %vm872_vm4, %v853_v44 }
 0x14e   :  { %v631_v47 = vadd.f32 %v2198_v46, %v2655_v14  ;;  %v625_v48 = vpop.f32.mrb[55].mxu0  ;;  %v855_v52 = vsel %vm727_vm10, %v621_v39, %v791_v43 }
 0x14f   :  { %v626_v49 = vadd.f32 %v625_v48, %v2655_v14  ;;  %v854_v50 = vsel %vm726_vm11, %v616_v41, %v790_v45 }
 0x150   :  { %v793_v51 = vmul.f32 0.2, %v631_v47  ;;  %2293 = vmatprep.mubr.msk.f32.mxu1 %vm872_vm4, %v854_v50  ;;  %vm729_vm12 = vcmp.gt.f32.partialorder %v631_v47, 0.0 }
 0x151   :  { %vm728_vm13 = vcmp.gt.f32.partialorder %v626_v49, 0.0  ;;  %v792_v53 = vmul.f32 0.2, %v626_v49  ;;  %v2201_v54 = vpop.f32.mrb[56].mxu0  ;;  %2294 = vmatmul.mubr.msk.f32.gmra.mrb[52].mxu1 %vm872_vm4, %v855_v52 }
 0x152   :  { %v641_v55 = vadd.f32 %v2201_v54, %v2655_v14  ;;  %v635_v56 = vpop.f32.mrb[57].mxu0  ;;  %v857_v60 = vsel %vm729_vm12, %v631_v47, %v793_v51 }
 0x153   :  { %v636_v57 = vadd.f32 %v635_v56, %v2655_v14  ;;  %v856_v58 = vsel %vm728_vm13, %v626_v49, %v792_v53 }
 0x154   :  { %v795_v59 = vmul.f32 0.2, %v641_v55  ;;  %2296 = vmatprep.mubr.msk.f32.mxu1 %vm872_vm4, %v856_v58  ;;  %vm731_vm14 = vcmp.gt.f32.partialorder %v641_v55, 0.0 }
 0x155   :  { %vm730_vm15 = vcmp.gt.f32.partialorder %v636_v57, 0.0  ;;  %v794_v61 = vmul.f32 0.2, %v636_v57  ;;  %v2204_v62 = vpop.f32.mrb[58].mxu0  ;;  %2297 = vmatmul.mubr.msk.f32.gmra.mrb[54].mxu1 %vm872_vm4, %v857_v60 }
 0x156   :  { %v651_v63 = vadd.f32 %v2204_v62, %v2655_v14  ;;  %v645_v0 = vpop.f32.mrb[59].mxu0  ;;  %v859_v4 = vsel %vm731_vm14, %v641_v55, %v795_v59 }
 0x157   :  { %v646_v1 = vadd.f32 %v645_v0, %v2655_v14  ;;  %v858_v2 = vsel %vm730_vm15, %v636_v57, %v794_v61 }
 0x158   :  { %v797_v3 = vmul.f32 0.2, %v651_v63  ;;  %2299 = vmatprep.mubr.msk.f32.mxu1 %vm872_vm4, %v858_v2  ;;  %vm733_vm0 = vcmp.gt.f32.partialorder %v651_v63, 0.0 }
 0x159   :  { %vm732_vm1 = vcmp.gt.f32.partialorder %v646_v1, 0.0  ;;  %v796_v5 = vmul.f32 0.2, %v646_v1  ;;  %v2207_v6 = vpop.f32.mrb[60].mxu0  ;;  %2300 = vmatmul.mubr.msk.f32.gmra.mrb[56].mxu1 %vm872_vm4, %v859_v4 }
 0x15a   :  { %v661_v7 = vadd.f32 %v2207_v6, %v2655_v14  ;;  %v655_v8 = vpop.f32.mrb[61].mxu0  ;;  %v861_v15 = vsel %vm733_vm0, %v651_v63, %v797_v3 }
 0x15b   :  { %v656_v9 = vadd.f32 %v655_v8, %v2655_v14  ;;  %v860_v10 = vsel %vm732_vm1, %v646_v1, %v796_v5 }
 0x15c   :  { %v799_v12 = vmul.f32 0.2, %v661_v7  ;;  %2302 = vmatprep.mubr.msk.f32.mxu1 %vm872_vm4, %v860_v10  ;;  %vm735_vm2 = vcmp.gt.f32.partialorder %v661_v7, 0.0 }
 0x15d   :  { %vm734_vm3 = vcmp.gt.f32.partialorder %v656_v9, 0.0  ;;  %v798_v16 = vmul.f32 0.2, %v656_v9  ;;  %v2210_v17 = vpop.f32.mrb[62].mxu0  ;;  %2303 = vmatmul.mubr.msk.f32.gmra.mrb[58].mxu1 %vm872_vm4, %v861_v15 }
 0x15e   :  { %v671_v18 = vadd.f32 %v2210_v17, %v2655_v14  ;;  %v665_v19 = vpop.f32.mrb[63].mxu0  ;;  %v863_v23 = vsel %vm735_vm2, %v661_v7, %v799_v12 }
 0x15f   :  { %v666_v20 = vadd.f32 %v665_v19, %v2655_v14  ;;  %v862_v21 = vsel %vm734_vm3, %v656_v9, %v798_v16  ;;  %v2787_v14 = vrot.slane %v2652_v13, %v870_v27 }
 0x160   :  { %v801_v22 = vmul.f32 0.2, %v671_v18  ;;  %2305 = vmatprep.mubr.msk.f32.mxu1 %vm872_vm4, %v862_v21  ;;  %vm737_vm5 = vcmp.gt.f32.partialorder %v671_v18, 0.0 }
 0x161   :  { %vm736_vm6 = vcmp.gt.f32.partialorder %v666_v20, 0.0  ;;  %v800_v24 = vmul.f32 0.2, %v666_v20  ;;  %2306 = vmatmul.mubr.msk.f32.gmra.mrb[60].mxu1 %vm872_vm4, %v863_v23 }
 0x162   :  { %v865_v26 = vsel %vm737_vm5, %v671_v18, %v801_v22 }
 0x163   :  { %v864_v25 = vsel %vm736_vm6, %v666_v20, %v800_v24 }
 0x164   :  { %2308 = vmatprep.mubr.msk.f32.mxu1 %vm872_vm4, %v864_v25 }
 0x165   :  { %2309 = vmatmul.mubr.msk.f32.gmra.mrb[62].mxu1 %vm872_vm4, %v865_v26 }
 0x1bc   :  { %v2217_v28 = vpop.f32.mrb[0].mxu1 }
 0x1bd   :  { %v1137_v29 = vadd.f32 %v2217_v28, %v2787_v14  ;;  %v1131_v30 = vpop.f32.mrb[1].mxu1 }
 0x1be   :  { %v1132_v31 = vadd.f32 %v1131_v30, %v2787_v14 }
 0x1bf   :  { %vm1451_vm7 = vcmp.gt.f32.partialorder %v1137_v29, 0.0  ;;  %v1515_v32 = vmul.f32 0.2, %v1137_v29 }
 0x1c0   :  { %vm1450_vm9 = vcmp.gt.f32.partialorder %v1132_v31, 0.0  ;;  %v1514_v33 = vmul.f32 0.2, %v1132_v31  ;;  %v2220_v34 = vpop.f32.mrb[2].mxu1 }
 0x1c1   :  { %v1579_v35 = vsel %vm1451_vm7, %v1137_v29, %v1515_v32  ;;  %v1147_v36 = vadd.f32 %v2220_v34, %v2787_v14  ;;  %v1141_v37 = vpop.f32.mrb[3].mxu1 }
 0x1c2   :  { %v1644_v38 = vsel %vm1642_vm8, %v1579_v35, 0.0  ;;  %v1578_v13 = vsel %vm1450_vm9, %v1132_v31, %v1514_v33  ;;  %v1142_v39 = vadd.f32 %v1141_v37, %v2787_v14 }
 0x1c3   :  { %v1643_v40 = vsel %vm1642_vm8, %v1578_v13, 0.0  ;;  %vm1453_vm4 = vcmp.gt.f32.partialorder %v1147_v36, 0.0  ;;  %v1517_v41 = vmul.f32 0.2, %v1147_v36 }
 0x1c4   :  { %v1645_v42 = vadd.f32 %v1644_v38, %v1643_v40  ;;  %vm1452_vm10 = vcmp.gt.f32.partialorder %v1142_v39, 0.0  ;;  %v1516_v43 = vmul.f32 0.2, %v1142_v39  ;;  %v2223_v44 = vpop.f32.mrb[4].mxu1 }
 0x1c5   :  { %v1157_v45 = vadd.f32 %v2223_v44, %v2787_v14  ;;  %v1151_v46 = vpop.f32.mrb[5].mxu1  ;;  %v1581_v47 = vsel %vm1453_vm4, %v1147_v36, %v1517_v41 }
 0x1c6   :  { %v1580_v48 = vsel %vm1452_vm10, %v1142_v39, %v1516_v43  ;;  %v1152_v49 = vadd.f32 %v1151_v46, %v2787_v14  ;;  %v1648_v55 = vsel %vm1642_vm8, %v1581_v47, 0.0 }
 0x1c7   :  { %v1646_v50 = vsel %vm1642_vm8, %v1580_v48, 0.0  ;;  %vm1455_vm11 = vcmp.gt.f32.partialorder %v1157_v45, 0.0  ;;  %v1519_v51 = vmul.f32 0.2, %v1157_v45 }
 0x1c8   :  { %v1647_v52 = vadd.f32 %v1646_v50, %v1645_v42  ;;  %vm1454_vm12 = vcmp.gt.f32.partialorder %v1152_v49, 0.0  ;;  %v1518_v53 = vmul.f32 0.2, %v1152_v49  ;;  %v2226_v54 = vpop.f32.mrb[6].mxu1 }
 0x1c9   :  { %v1167_v56 = vadd.f32 %v2226_v54, %v2787_v14  ;;  %v1161_v57 = vpop.f32.mrb[7].mxu1  ;;  %v1583_v58 = vsel %vm1455_vm11, %v1157_v45, %v1519_v51 }
 0x1ca   :  { %v1582_v59 = vsel %vm1454_vm12, %v1152_v49, %v1518_v53  ;;  %v1649_v60 = vadd.f32 %v1648_v55, %v1647_v52  ;;  %v1162_v61 = vadd.f32 %v1161_v57, %v2787_v14  ;;  %v1652_v3 = vsel %vm1642_vm8, %v1583_v58, 0.0 }
 0x1cb   :  { %v1650_v62 = vsel %vm1642_vm8, %v1582_v59, 0.0  ;;  %vm1457_vm13 = vcmp.gt.f32.partialorder %v1167_v56, 0.0  ;;  %v1521_v63 = vmul.f32 0.2, %v1167_v56 }
 0x1cc   :  { %v1651_v0 = vadd.f32 %v1650_v62, %v1649_v60  ;;  %vm1456_vm14 = vcmp.gt.f32.partialorder %v1162_v61, 0.0  ;;  %v1520_v1 = vmul.f32 0.2, %v1162_v61  ;;  %v2229_v2 = vpop.f32.mrb[8].mxu1 }
 0x1cd   :  { %v1177_v4 = vadd.f32 %v2229_v2, %v2787_v14  ;;  %v1171_v5 = vpop.f32.mrb[9].mxu1  ;;  %v1585_v6 = vsel %vm1457_vm13, %v1167_v56, %v1521_v63 }
 0x1ce   :  { %v1584_v7 = vsel %vm1456_vm14, %v1162_v61, %v1520_v1  ;;  %v1653_v8 = vadd.f32 %v1652_v3, %v1651_v0  ;;  %v1172_v9 = vadd.f32 %v1171_v5, %v2787_v14  ;;  %v1656_v18 = vsel %vm1642_vm8, %v1585_v6, 0.0 }
 0x1cf   :  { %v1654_v10 = vsel %vm1642_vm8, %v1584_v7, 0.0  ;;  %vm1459_vm15 = vcmp.gt.f32.partialorder %v1177_v4, 0.0  ;;  %v1523_v12 = vmul.f32 0.2, %v1177_v4 }
 0x1d0   :  { %v1655_v15 = vadd.f32 %v1654_v10, %v1653_v8  ;;  %vm1458_vm0 = vcmp.gt.f32.partialorder %v1172_v9, 0.0  ;;  %v1522_v16 = vmul.f32 0.2, %v1172_v9  ;;  %v2232_v17 = vpop.f32.mrb[10].mxu1 }
 0x1d1   :  { %v1187_v19 = vadd.f32 %v2232_v17, %v2787_v14  ;;  %v1181_v20 = vpop.f32.mrb[11].mxu1  ;;  %v1587_v21 = vsel %vm1459_vm15, %v1177_v4, %v1523_v12 }
 0x1d2   :  { %v1586_v22 = vsel %vm1458_vm0, %v1172_v9, %v1522_v16  ;;  %v1657_v23 = vadd.f32 %v1656_v18, %v1655_v15  ;;  %v1182_v24 = vadd.f32 %v1181_v20, %v2787_v14  ;;  %v1660_v30 = vsel %vm1642_vm8, %v1587_v21, 0.0 }
 0x1d3   :  { %v1658_v25 = vsel %vm1642_vm8, %v1586_v22, 0.0  ;;  %vm1461_vm1 = vcmp.gt.f32.partialorder %v1187_v19, 0.0  ;;  %v1525_v26 = vmul.f32 0.2, %v1187_v19 }
 0x1d4   :  { %v1659_v27 = vadd.f32 %v1658_v25, %v1657_v23  ;;  %vm1460_vm2 = vcmp.gt.f32.partialorder %v1182_v24, 0.0  ;;  %v1524_v28 = vmul.f32 0.2, %v1182_v24  ;;  %v2235_v29 = vpop.f32.mrb[12].mxu1 }
 0x1d5   :  { %v1197_v31 = vadd.f32 %v2235_v29, %v2787_v14  ;;  %v1191_v32 = vpop.f32.mrb[13].mxu1  ;;  %v1589_v33 = vsel %vm1461_vm1, %v1187_v19, %v1525_v26 }
 0x1d6   :  { %v1588_v34 = vsel %vm1460_vm2, %v1182_v24, %v1524_v28  ;;  %v1661_v35 = vadd.f32 %v1660_v30, %v1659_v27  ;;  %v1192_v36 = vadd.f32 %v1191_v32, %v2787_v14  ;;  %v1664_v41 = vsel %vm1642_vm8, %v1589_v33, 0.0 }
 0x1d7   :  { %v1662_v37 = vsel %vm1642_vm8, %v1588_v34, 0.0  ;;  %vm1463_vm3 = vcmp.gt.f32.partialorder %v1197_v31, 0.0  ;;  %v1527_v38 = vmul.f32 0.2, %v1197_v31 }
 0x1d8   :  { %v1663_v13 = vadd.f32 %v1662_v37, %v1661_v35  ;;  %vm1462_vm5 = vcmp.gt.f32.partialorder %v1192_v36, 0.0  ;;  %v1526_v39 = vmul.f32 0.2, %v1192_v36  ;;  %v2238_v40 = vpop.f32.mrb[14].mxu1 }
 0x1d9   :  { %v1207_v42 = vadd.f32 %v2238_v40, %v2787_v14  ;;  %v1201_v43 = vpop.f32.mrb[15].mxu1  ;;  %v1591_v44 = vsel %vm1463_vm3, %v1197_v31, %v1527_v38 }
 0x1da   :  { %v1590_v45 = vsel %vm1462_vm5, %v1192_v36, %v1526_v39  ;;  %v1665_v46 = vadd.f32 %v1664_v41, %v1663_v13  ;;  %v1202_v47 = vadd.f32 %v1201_v43, %v2787_v14  ;;  %v1668_v53 = vsel %vm1642_vm8, %v1591_v44, 0.0 }
 0x1db   :  { %v1666_v48 = vsel %vm1642_vm8, %v1590_v45, 0.0  ;;  %vm1465_vm6 = vcmp.gt.f32.partialorder %v1207_v42, 0.0  ;;  %v1529_v49 = vmul.f32 0.2, %v1207_v42 }
 0x1dc   :  { %v1667_v50 = vadd.f32 %v1666_v48, %v1665_v46  ;;  %vm1464_vm7 = vcmp.gt.f32.partialorder %v1202_v47, 0.0  ;;  %v1528_v51 = vmul.f32 0.2, %v1202_v47  ;;  %v2241_v52 = vpop.f32.mrb[16].mxu1 }
 0x1dd   :  { %v1217_v54 = vadd.f32 %v2241_v52, %v2787_v14  ;;  %v1211_v55 = vpop.f32.mrb[17].mxu1  ;;  %v1593_v56 = vsel %vm1465_vm6, %v1207_v42, %v1529_v49 }
 0x1de   :  { %v1592_v57 = vsel %vm1464_vm7, %v1202_v47, %v1528_v51  ;;  %v1669_v58 = vadd.f32 %v1668_v53, %v1667_v50  ;;  %v1212_v59 = vadd.f32 %v1211_v55, %v2787_v14  ;;  %v1672_v1 = vsel %vm1642_vm8, %v1593_v56, 0.0 }
 0x1df   :  { %v1670_v60 = vsel %vm1642_vm8, %v1592_v57, 0.0  ;;  %vm1467_vm9 = vcmp.gt.f32.partialorder %v1217_v54, 0.0  ;;  %v1531_v61 = vmul.f32 0.2, %v1217_v54 }
 0x1e0   :  { %v1671_v62 = vadd.f32 %v1670_v60, %v1669_v58  ;;  %vm1466_vm4 = vcmp.gt.f32.partialorder %v1212_v59, 0.0  ;;  %v1530_v63 = vmul.f32 0.2, %v1212_v59  ;;  %v2244_v0 = vpop.f32.mrb[18].mxu1 }
 0x1e1   :  { %v1227_v2 = vadd.f32 %v2244_v0, %v2787_v14  ;;  %v1221_v3 = vpop.f32.mrb[19].mxu1  ;;  %v1595_v4 = vsel %vm1467_vm9, %v1217_v54, %v1531_v61 }
 0x1e2   :  { %v1594_v5 = vsel %vm1466_vm4, %v1212_v59, %v1530_v63  ;;  %v1673_v6 = vadd.f32 %v1672_v1, %v1671_v62  ;;  %v1222_v7 = vadd.f32 %v1221_v3, %v2787_v14  ;;  %v1676_v16 = vsel %vm1642_vm8, %v1595_v4, 0.0 }
 0x1e3   :  { %v1674_v8 = vsel %vm1642_vm8, %v1594_v5, 0.0  ;;  %vm1469_vm10 = vcmp.gt.f32.partialorder %v1227_v2, 0.0  ;;  %v1533_v9 = vmul.f32 0.2, %v1227_v2 }
 0x1e4   :  { %v1675_v10 = vadd.f32 %v1674_v8, %v1673_v6  ;;  %vm1468_vm11 = vcmp.gt.f32.partialorder %v1222_v7, 0.0  ;;  %v1532_v12 = vmul.f32 0.2, %v1222_v7  ;;  %v2247_v15 = vpop.f32.mrb[20].mxu1 }
 0x1e5   :  { %v1237_v17 = vadd.f32 %v2247_v15, %v2787_v14  ;;  %v1231_v18 = vpop.f32.mrb[21].mxu1  ;;  %v1597_v19 = vsel %vm1469_vm10, %v1227_v2, %v1533_v9 }
 0x1e6   :  { %v1596_v20 = vsel %vm1468_vm11, %v1222_v7, %v1532_v12  ;;  %v1677_v21 = vadd.f32 %v1676_v16, %v1675_v10  ;;  %v1232_v22 = vadd.f32 %v1231_v18, %v2787_v14  ;;  %v1680_v28 = vsel %vm1642_vm8, %v1597_v19, 0.0 }
 0x1e7   :  { %v1678_v23 = vsel %vm1642_vm8, %v1596_v20, 0.0  ;;  %vm1471_vm12 = vcmp.gt.f32.partialorder %v1237_v17, 0.0  ;;  %v1535_v24 = vmul.f32 0.2, %v1237_v17 }
 0x1e8   :  { %v1679_v25 = vadd.f32 %v1678_v23, %v1677_v21  ;;  %vm1470_vm13 = vcmp.gt.f32.partialorder %v1232_v22, 0.0  ;;  %v1534_v26 = vmul.f32 0.2, %v1232_v22  ;;  %v2250_v27 = vpop.f32.mrb[22].mxu1 }
 0x1e9   :  { %v1247_v29 = vadd.f32 %v2250_v27, %v2787_v14  ;;  %v1241_v30 = vpop.f32.mrb[23].mxu1  ;;  %v1599_v31 = vsel %vm1471_vm12, %v1237_v17, %v1535_v24 }
 0x1ea   :  { %v1598_v32 = vsel %vm1470_vm13, %v1232_v22, %v1534_v26  ;;  %v1681_v33 = vadd.f32 %v1680_v28, %v1679_v25  ;;  %v1242_v34 = vadd.f32 %v1241_v30, %v2787_v14  ;;  %v1684_v39 = vsel %vm1642_vm8, %v1599_v31, 0.0 }
 0x1eb   :  { %v1682_v35 = vsel %vm1642_vm8, %v1598_v32, 0.0  ;;  %vm1473_vm14 = vcmp.gt.f32.partialorder %v1247_v29, 0.0  ;;  %v1537_v36 = vmul.f32 0.2, %v1247_v29 }
 0x1ec   :  { %v1683_v37 = vadd.f32 %v1682_v35, %v1681_v33  ;;  %vm1472_vm15 = vcmp.gt.f32.partialorder %v1242_v34, 0.0  ;;  %v1536_v38 = vmul.f32 0.2, %v1242_v34  ;;  %v2253_v13 = vpop.f32.mrb[24].mxu1 }
 0x1ed   :  { %v1257_v40 = vadd.f32 %v2253_v13, %v2787_v14  ;;  %v1251_v41 = vpop.f32.mrb[25].mxu1  ;;  %v1601_v42 = vsel %vm1473_vm14, %v1247_v29, %v1537_v36 }
 0x1ee   :  { %v1600_v43 = vsel %vm1472_vm15, %v1242_v34, %v1536_v38  ;;  %v1685_v44 = vadd.f32 %v1684_v39, %v1683_v37  ;;  %v1252_v45 = vadd.f32 %v1251_v41, %v2787_v14  ;;  %v1688_v51 = vsel %vm1642_vm8, %v1601_v42, 0.0 }
 0x1ef   :  { %v1686_v46 = vsel %vm1642_vm8, %v1600_v43, 0.0  ;;  %vm1475_vm0 = vcmp.gt.f32.partialorder %v1257_v40, 0.0  ;;  %v1539_v47 = vmul.f32 0.2, %v1257_v40 }
 0x1f0   :  { %v1687_v48 = vadd.f32 %v1686_v46, %v1685_v44  ;;  %vm1474_vm1 = vcmp.gt.f32.partialorder %v1252_v45, 0.0  ;;  %v1538_v49 = vmul.f32 0.2, %v1252_v45  ;;  %v2256_v50 = vpop.f32.mrb[26].mxu1 }
 0x1f1   :  { %v1267_v52 = vadd.f32 %v2256_v50, %v2787_v14  ;;  %v1261_v53 = vpop.f32.mrb[27].mxu1  ;;  %v1603_v54 = vsel %vm1475_vm0, %v1257_v40, %v1539_v47 }
 0x1f2   :  { %v1602_v55 = vsel %vm1474_vm1, %v1252_v45, %v1538_v49  ;;  %v1689_v56 = vadd.f32 %v1688_v51, %v1687_v48  ;;  %v1262_v57 = vadd.f32 %v1261_v53, %v2787_v14  ;;  %v1692_v63 = vsel %vm1642_vm8, %v1603_v54, 0.0 }
 0x1f3   :  { %v1690_v58 = vsel %vm1642_vm8, %v1602_v55, 0.0  ;;  %vm1477_vm2 = vcmp.gt.f32.partialorder %v1267_v52, 0.0  ;;  %v1541_v59 = vmul.f32 0.2, %v1267_v52 }
 0x1f4   :  { %v1691_v60 = vadd.f32 %v1690_v58, %v1689_v56  ;;  %vm1476_vm3 = vcmp.gt.f32.partialorder %v1262_v57, 0.0  ;;  %v1540_v61 = vmul.f32 0.2, %v1262_v57  ;;  %v2259_v62 = vpop.f32.mrb[28].mxu1 }
 0x1f5   :  { %v1277_v0 = vadd.f32 %v2259_v62, %v2787_v14  ;;  %v1271_v1 = vpop.f32.mrb[29].mxu1  ;;  %v1605_v2 = vsel %vm1477_vm2, %v1267_v52, %v1541_v59 }
 0x1f6   :  { %v1604_v3 = vsel %vm1476_vm3, %v1262_v57, %v1540_v61  ;;  %v1693_v4 = vadd.f32 %v1692_v63, %v1691_v60  ;;  %v1272_v5 = vadd.f32 %v1271_v1, %v2787_v14  ;;  %v1696_v12 = vsel %vm1642_vm8, %v1605_v2, 0.0 }
 0x1f7   :  { %v1694_v6 = vsel %vm1642_vm8, %v1604_v3, 0.0  ;;  %vm1479_vm5 = vcmp.gt.f32.partialorder %v1277_v0, 0.0  ;;  %v1543_v7 = vmul.f32 0.2, %v1277_v0 }
 0x1f8   :  { %v1695_v8 = vadd.f32 %v1694_v6, %v1693_v4  ;;  %vm1478_vm6 = vcmp.gt.f32.partialorder %v1272_v5, 0.0  ;;  %v1542_v9 = vmul.f32 0.2, %v1272_v5  ;;  %v2262_v10 = vpop.f32.mrb[30].mxu1 }
 0x1f9   :  { %v1287_v15 = vadd.f32 %v2262_v10, %v2787_v14  ;;  %v1281_v16 = vpop.f32.mrb[31].mxu1  ;;  %v1607_v17 = vsel %vm1479_vm5, %v1277_v0, %v1543_v7 }
 0x1fa   :  { %v1606_v18 = vsel %vm1478_vm6, %v1272_v5, %v1542_v9  ;;  %v1697_v19 = vadd.f32 %v1696_v12, %v1695_v8  ;;  %v1282_v20 = vadd.f32 %v1281_v16, %v2787_v14  ;;  %v1700_v26 = vsel %vm1642_vm8, %v1607_v17, 0.0 }
 0x1fb   :  { %v1698_v21 = vsel %vm1642_vm8, %v1606_v18, 0.0  ;;  %vm1481_vm7 = vcmp.gt.f32.partialorder %v1287_v15, 0.0  ;;  %v1545_v22 = vmul.f32 0.2, %v1287_v15 }
 0x1fc   :  { %v1699_v23 = vadd.f32 %v1698_v21, %v1697_v19  ;;  %vm1480_vm9 = vcmp.gt.f32.partialorder %v1282_v20, 0.0  ;;  %v1544_v24 = vmul.f32 0.2, %v1282_v20  ;;  %v2265_v25 = vpop.f32.mrb[32].mxu1 }
 0x1fd   :  { %v1297_v27 = vadd.f32 %v2265_v25, %v2787_v14  ;;  %v1291_v28 = vpop.f32.mrb[33].mxu1  ;;  %v1609_v29 = vsel %vm1481_vm7, %v1287_v15, %v1545_v22 }
 0x1fe   :  { %v1608_v30 = vsel %vm1480_vm9, %v1282_v20, %v1544_v24  ;;  %v1701_v31 = vadd.f32 %v1700_v26, %v1699_v23  ;;  %v1292_v32 = vadd.f32 %v1291_v28, %v2787_v14  ;;  %v1704_v38 = vsel %vm1642_vm8, %v1609_v29, 0.0 }
 0x1ff   :  { %v1702_v33 = vsel %vm1642_vm8, %v1608_v30, 0.0  ;;  %vm1483_vm4 = vcmp.gt.f32.partialorder %v1297_v27, 0.0  ;;  %v1547_v34 = vmul.f32 0.2, %v1297_v27 }
 0x200   :  { %v1703_v35 = vadd.f32 %v1702_v33, %v1701_v31  ;;  %vm1482_vm10 = vcmp.gt.f32.partialorder %v1292_v32, 0.0  ;;  %v1546_v36 = vmul.f32 0.2, %v1292_v32  ;;  %v2268_v37 = vpop.f32.mrb[34].mxu1 }
 0x201   :  { %v1611_v13 = vsel %vm1483_vm4, %v1297_v27, %v1547_v34  ;;  %v1307_v39 = vadd.f32 %v2268_v37, %v2787_v14  ;;  %v1301_v40 = vpop.f32.mrb[35].mxu1 }
 0x202   :  { %v2856_v41 = vadd.f32 %v1704_v38, %v1703_v35  ;;  %v1713_v42 = vsel %vm1642_vm8, %v1611_v13, 0.0  ;;  %v1610_v43 = vsel %vm1482_vm10, %v1292_v32, %v1546_v36  ;;  %v1302_v44 = vadd.f32 %v1301_v40, %v2787_v14 }
 0x203   :  { %v1712_v45 = vsel %vm1642_vm8, %v1610_v43, 0.0  ;;  %vm1485_vm11 = vcmp.gt.f32.partialorder %v1307_v39, 0.0  ;;  %v1549_v46 = vmul.f32 0.2, %v1307_v39 }
 0x204   :  { %v1714_v47 = vadd.f32 %v1713_v42, %v1712_v45  ;;  %vm1484_vm12 = vcmp.gt.f32.partialorder %v1302_v44, 0.0  ;;  %v1548_v48 = vmul.f32 0.2, %v1302_v44  ;;  %v2271_v49 = vpop.f32.mrb[36].mxu1 }
 0x205   :  { %v1317_v50 = vadd.f32 %v2271_v49, %v2787_v14  ;;  %v1311_v51 = vpop.f32.mrb[37].mxu1  ;;  %v1613_v52 = vsel %vm1485_vm11, %v1307_v39, %v1549_v46 }
 0x206   :  { %v1612_v53 = vsel %vm1484_vm12, %v1302_v44, %v1548_v48  ;;  %v1312_v54 = vadd.f32 %v1311_v51, %v2787_v14  ;;  %v1717_v60 = vsel %vm1642_vm8, %v1613_v52, 0.0 }
 0x207   :  { %v1715_v55 = vsel %vm1642_vm8, %v1612_v53, 0.0  ;;  %vm1487_vm13 = vcmp.gt.f32.partialorder %v1317_v50, 0.0  ;;  %v1551_v56 = vmul.f32 0.2, %v1317_v50 }
 0x208   :  { %v1716_v57 = vadd.f32 %v1715_v55, %v1714_v47  ;;  %vm1486_vm14 = vcmp.gt.f32.partialorder %v1312_v54, 0.0  ;;  %v1550_v58 = vmul.f32 0.2, %v1312_v54  ;;  %v2274_v59 = vpop.f32.mrb[38].mxu1 }
 0x209   :  { %v1327_v61 = vadd.f32 %v2274_v59, %v2787_v14  ;;  %v1321_v62 = vpop.f32.mrb[39].mxu1  ;;  %v1615_v63 = vsel %vm1487_vm13, %v1317_v50, %v1551_v56 }
 0x20a   :  { %v1614_v0 = vsel %vm1486_vm14, %v1312_v54, %v1550_v58  ;;  %v1718_v1 = vadd.f32 %v1717_v60, %v1716_v57  ;;  %v1322_v2 = vadd.f32 %v1321_v62, %v2787_v14  ;;  %v1721_v8 = vsel %vm1642_vm8, %v1615_v63, 0.0 }
 0x20b   :  { %v1719_v3 = vsel %vm1642_vm8, %v1614_v0, 0.0  ;;  %vm1489_vm15 = vcmp.gt.f32.partialorder %v1327_v61, 0.0  ;;  %v1553_v4 = vmul.f32 0.2, %v1327_v61 }
 0x20c   :  { %v1720_v5 = vadd.f32 %v1719_v3, %v1718_v1  ;;  %vm1488_vm0 = vcmp.gt.f32.partialorder %v1322_v2, 0.0  ;;  %v1552_v6 = vmul.f32 0.2, %v1322_v2  ;;  %v2277_v7 = vpop.f32.mrb[40].mxu1 }
 0x20d   :  { %v1337_v9 = vadd.f32 %v2277_v7, %v2787_v14  ;;  %v1331_v10 = vpop.f32.mrb[41].mxu1  ;;  %v1617_v12 = vsel %vm1489_vm15, %v1327_v61, %v1553_v4 }
 0x20e   :  { %v1616_v15 = vsel %vm1488_vm0, %v1322_v2, %v1552_v6  ;;  %v1722_v16 = vadd.f32 %v1721_v8, %v1720_v5  ;;  %v1332_v17 = vadd.f32 %v1331_v10, %v2787_v14  ;;  %v1725_v23 = vsel %vm1642_vm8, %v1617_v12, 0.0 }
 0x20f   :  { %v1723_v18 = vsel %vm1642_vm8, %v1616_v15, 0.0  ;;  %vm1491_vm1 = vcmp.gt.f32.partialorder %v1337_v9, 0.0  ;;  %v1555_v19 = vmul.f32 0.2, %v1337_v9 }
 0x210   :  { %v1724_v20 = vadd.f32 %v1723_v18, %v1722_v16  ;;  %vm1490_vm2 = vcmp.gt.f32.partialorder %v1332_v17, 0.0  ;;  %v1554_v21 = vmul.f32 0.2, %v1332_v17  ;;  %v2280_v22 = vpop.f32.mrb[42].mxu1 }
 0x211   :  { %v1347_v24 = vadd.f32 %v2280_v22, %v2787_v14  ;;  %v1341_v25 = vpop.f32.mrb[43].mxu1  ;;  %v1619_v26 = vsel %vm1491_vm1, %v1337_v9, %v1555_v19 }
 0x212   :  { %v1618_v27 = vsel %vm1490_vm2, %v1332_v17, %v1554_v21  ;;  %v1726_v28 = vadd.f32 %v1725_v23, %v1724_v20  ;;  %v1342_v29 = vadd.f32 %v1341_v25, %v2787_v14  ;;  %v1729_v35 = vsel %vm1642_vm8, %v1619_v26, 0.0 }
 0x213   :  { %v1727_v30 = vsel %vm1642_vm8, %v1618_v27, 0.0  ;;  %vm1493_vm3 = vcmp.gt.f32.partialorder %v1347_v24, 0.0  ;;  %v1557_v31 = vmul.f32 0.2, %v1347_v24 }
 0x214   :  { %v1728_v32 = vadd.f32 %v1727_v30, %v1726_v28  ;;  %vm1492_vm5 = vcmp.gt.f32.partialorder %v1342_v29, 0.0  ;;  %v1556_v33 = vmul.f32 0.2, %v1342_v29  ;;  %v2283_v34 = vpop.f32.mrb[44].mxu1 }
 0x215   :  { %v1357_v36 = vadd.f32 %v2283_v34, %v2787_v14  ;;  %v1351_v37 = vpop.f32.mrb[45].mxu1  ;;  %v1621_v38 = vsel %vm1493_vm3, %v1347_v24, %v1557_v31 }
 0x216   :  { %v1620_v13 = vsel %vm1492_vm5, %v1342_v29, %v1556_v33  ;;  %v1730_v39 = vadd.f32 %v1729_v35, %v1728_v32  ;;  %v1352_v40 = vadd.f32 %v1351_v37, %v2787_v14  ;;  %v1733_v47 = vsel %vm1642_vm8, %v1621_v38, 0.0 }
 0x217   :  { %v1731_v42 = vsel %vm1642_vm8, %v1620_v13, 0.0  ;;  %vm1495_vm6 = vcmp.gt.f32.partialorder %v1357_v36, 0.0  ;;  %v1559_v43 = vmul.f32 0.2, %v1357_v36 }
 0x218   :  { %v1732_v44 = vadd.f32 %v1731_v42, %v1730_v39  ;;  %vm1494_vm7 = vcmp.gt.f32.partialorder %v1352_v40, 0.0  ;;  %v1558_v45 = vmul.f32 0.2, %v1352_v40  ;;  %v2286_v46 = vpop.f32.mrb[46].mxu1 }
 0x219   :  { %v1367_v48 = vadd.f32 %v2286_v46, %v2787_v14  ;;  %v1361_v49 = vpop.f32.mrb[47].mxu1  ;;  %v1623_v50 = vsel %vm1495_vm6, %v1357_v36, %v1559_v43 }
 0x21a   :  { %v1622_v51 = vsel %vm1494_vm7, %v1352_v40, %v1558_v45  ;;  %v1734_v52 = vadd.f32 %v1733_v47, %v1732_v44  ;;  %v1362_v53 = vadd.f32 %v1361_v49, %v2787_v14  ;;  %v1737_v59 = vsel %vm1642_vm8, %v1623_v50, 0.0 }
 0x21b   :  { %v1735_v54 = vsel %vm1642_vm8, %v1622_v51, 0.0  ;;  %vm1497_vm9 = vcmp.gt.f32.partialorder %v1367_v48, 0.0  ;;  %v1561_v55 = vmul.f32 0.2, %v1367_v48 }
 0x21c   :  { %v1736_v56 = vadd.f32 %v1735_v54, %v1734_v52  ;;  %vm1496_vm4 = vcmp.gt.f32.partialorder %v1362_v53, 0.0  ;;  %v1560_v57 = vmul.f32 0.2, %v1362_v53  ;;  %v2289_v58 = vpop.f32.mrb[48].mxu1 }
 0x21d   :  { %v1377_v60 = vadd.f32 %v2289_v58, %v2787_v14  ;;  %v1371_v61 = vpop.f32.mrb[49].mxu1  ;;  %v1625_v62 = vsel %vm1497_vm9, %v1367_v48, %v1561_v55 }
 0x21e   :  { %v1624_v63 = vsel %vm1496_vm4, %v1362_v53, %v1560_v57  ;;  %v1738_v0 = vadd.f32 %v1737_v59, %v1736_v56  ;;  %v1372_v1 = vadd.f32 %v1371_v61, %v2787_v14  ;;  %v1741_v7 = vsel %vm1642_vm8, %v1625_v62, 0.0 }
 0x21f   :  { %v1739_v2 = vsel %vm1642_vm8, %v1624_v63, 0.0  ;;  %vm1499_vm10 = vcmp.gt.f32.partialorder %v1377_v60, 0.0  ;;  %v1563_v3 = vmul.f32 0.2, %v1377_v60 }
 0x220   :  { %v1740_v4 = vadd.f32 %v1739_v2, %v1738_v0  ;;  %vm1498_vm11 = vcmp.gt.f32.partialorder %v1372_v1, 0.0  ;;  %v1562_v5 = vmul.f32 0.2, %v1372_v1  ;;  %v2292_v6 = vpop.f32.mrb[50].mxu1 }
 0x221   :  { %v1387_v8 = vadd.f32 %v2292_v6, %v2787_v14  ;;  %v1381_v9 = vpop.f32.mrb[51].mxu1  ;;  %v1627_v10 = vsel %vm1499_vm10, %v1377_v60, %v1563_v3 }
 0x222   :  { %v1626_v12 = vsel %vm1498_vm11, %v1372_v1, %v1562_v5  ;;  %v1742_v15 = vadd.f32 %v1741_v7, %v1740_v4  ;;  %v1382_v16 = vadd.f32 %v1381_v9, %v2787_v14  ;;  %v1745_v22 = vsel %vm1642_vm8, %v1627_v10, 0.0 }
 0x223   :  { %v1743_v17 = vsel %vm1642_vm8, %v1626_v12, 0.0  ;;  %vm1501_vm12 = vcmp.gt.f32.partialorder %v1387_v8, 0.0  ;;  %v1565_v18 = vmul.f32 0.2, %v1387_v8  ;;  %vm1795_vm11 = vcmask 254976  }
 0x224   :  { %v1744_v19 = vadd.f32 %v1743_v17, %v1742_v15  ;;  %vm1500_vm13 = vcmp.gt.f32.partialorder %v1382_v16, 0.0  ;;  %v1564_v20 = vmul.f32 0.2, %v1382_v16  ;;  %v2295_v21 = vpop.f32.mrb[52].mxu1 }
 0x225   :  { %v1397_v23 = vadd.f32 %v2295_v21, %v2787_v14  ;;  %v1391_v24 = vpop.f32.mrb[53].mxu1  ;;  %v1629_v25 = vsel %vm1501_vm12, %v1387_v8, %v1565_v18  ;;  %v1706_v18 = vrot.slane %v2856_v41, 4  ;;  %vm1814_vm12 = vcmask 1024  }
 0x226   :  { %v1628_v26 = vsel %vm1500_vm13, %v1382_v16, %v1564_v20  ;;  %v1746_v27 = vadd.f32 %v1745_v22, %v1744_v19  ;;  %v1392_v28 = vadd.f32 %v1391_v24, %v2787_v14  ;;  %v1749_v34 = vsel %vm1642_vm8, %v1629_v25, 0.0 }
 0x227   :  { %v1747_v29 = vsel %vm1642_vm8, %v1628_v26, 0.0  ;;  %vm1503_vm14 = vcmp.gt.f32.partialorder %v1397_v23, 0.0  ;;  %v1567_v30 = vmul.f32 0.2, %v1397_v23 }
 0x228   :  { %v1748_v31 = vadd.f32 %v1747_v29, %v1746_v27  ;;  %vm1502_vm15 = vcmp.gt.f32.partialorder %v1392_v28, 0.0  ;;  %v1566_v32 = vmul.f32 0.2, %v1392_v28  ;;  %v2298_v33 = vpop.f32.mrb[54].mxu1 }
 0x229   :  { %v1407_v35 = vadd.f32 %v2298_v33, %v2787_v14  ;;  %v1401_v36 = vpop.f32.mrb[55].mxu1  ;;  %v1631_v37 = vsel %vm1503_vm14, %v1397_v23, %v1567_v30 }
 0x22a   :  { %v1630_v38 = vsel %vm1502_vm15, %v1392_v28, %v1566_v32  ;;  %v1750_v13 = vadd.f32 %v1749_v34, %v1748_v31  ;;  %v1402_v39 = vadd.f32 %v1401_v36, %v2787_v14  ;;  %v1753_v46 = vsel %vm1642_vm8, %v1631_v37, 0.0 }
 0x22b   :  { %v1751_v40 = vsel %vm1642_vm8, %v1630_v38, 0.0  ;;  %vm1505_vm0 = vcmp.gt.f32.partialorder %v1407_v35, 0.0  ;;  %v1569_v42 = vmul.f32 0.2, %v1407_v35  ;;  %v1707_v31 = vadd.f32 %v1706_v18, %v2856_v41 }
 0x22c   :  { %v1752_v43 = vadd.f32 %v1751_v40, %v1750_v13  ;;  %vm1504_vm1 = vcmp.gt.f32.partialorder %v1402_v39, 0.0  ;;  %v1568_v44 = vmul.f32 0.2, %v1402_v39  ;;  %v2301_v45 = vpop.f32.mrb[56].mxu1 }
 0x22d   :  { %v1417_v47 = vadd.f32 %v2301_v45, %v2787_v14  ;;  %v1411_v48 = vpop.f32.mrb[57].mxu1  ;;  %v1633_v49 = vsel %vm1505_vm0, %v1407_v35, %v1569_v42 }
 0x22e   :  { %v1632_v50 = vsel %vm1504_vm1, %v1402_v39, %v1568_v44  ;;  %v1754_v51 = vadd.f32 %v1753_v46, %v1752_v43  ;;  %v1412_v52 = vadd.f32 %v1411_v48, %v2787_v14  ;;  %v1757_v58 = vsel %vm1642_vm8, %v1633_v49, 0.0 }
 0x22f   :  { %v1755_v53 = vsel %vm1642_vm8, %v1632_v50, 0.0  ;;  %vm1507_vm2 = vcmp.gt.f32.partialorder %v1417_v47, 0.0  ;;  %v1571_v54 = vmul.f32 0.2, %v1417_v47  ;;  %v1708_v39 = vrot.slane %v1707_v31, 2 }
 0x230   :  { %v1756_v55 = vadd.f32 %v1755_v53, %v1754_v51  ;;  %vm1506_vm3 = vcmp.gt.f32.partialorder %v1412_v52, 0.0  ;;  %v1570_v56 = vmul.f32 0.2, %v1412_v52  ;;  %v2304_v57 = vpop.f32.mrb[58].mxu1  ;;  %v1785_v49 = vsub.s32 2, %v2646_v11 }
 0x231   :  { %v1427_v59 = vadd.f32 %v2304_v57, %v2787_v14  ;;  %v1421_v60 = vpop.f32.mrb[59].mxu1  ;;  %v1635_v61 = vsel %vm1507_vm2, %v1417_v47, %v1571_v54  ;;  %v1709_v43 = vadd.f32 %v1708_v39, %v1707_v31  ;;  %v2330_v53 = vld [vmem:[%s2941_s3] sm:$0xf] }
 0x232   :  { %v1634_v62 = vsel %vm1506_vm3, %v1412_v52, %v1570_v56  ;;  %v1758_v63 = vadd.f32 %v1757_v58, %v1756_v55  ;;  %v1422_v0 = vadd.f32 %v1421_v60, %v2787_v14  ;;  %v1761_v6 = vsel %vm1642_vm8, %v1635_v61, 0.0 }
 0x233   :  { %v1759_v1 = vsel %vm1642_vm8, %v1634_v62, 0.0  ;;  %vm1509_vm5 = vcmp.gt.f32.partialorder %v1427_v59, 0.0  ;;  %v1573_v2 = vmul.f32 0.2, %v1427_v59  ;;  %v1710_v45 = vrot.slane %v1709_v43, 1 }
 0x234   :  { %v1760_v3 = vadd.f32 %v1759_v1, %v1758_v63  ;;  %vm1508_vm6 = vcmp.gt.f32.partialorder %v1422_v0, 0.0  ;;  %v1572_v4 = vmul.f32 0.2, %v1422_v0  ;;  %v2307_v5 = vpop.f32.mrb[60].mxu1  ;;  %v1786_v54 = vrot.slane %v2330_v53, %v1785_v49 }
 0x235   :  { %v1437_v7 = vadd.f32 %v2307_v5, %v2787_v14  ;;  %v1431_v8 = vpop.f32.mrb[61].mxu1  ;;  %v1637_v9 = vsel %vm1509_vm5, %v1427_v59, %v1573_v2  ;;  %v1711_v47 = vadd.f32 %v1710_v45, %v1709_v43  ;;  %v1801_v60 = vsub.s32 3, %v2646_v11 }
 0x236   :  { %v1636_v10 = vsel %vm1508_vm6, %v1422_v0, %v1572_v4  ;;  %v1762_v12 = vadd.f32 %v1761_v6, %v1760_v3  ;;  %v1432_v15 = vadd.f32 %v1431_v8, %v2787_v14  ;;  %v1765_v22 = vsel %vm1642_vm8, %v1637_v9, 0.0 }
 0x237   :  { %v1763_v16 = vsel %vm1642_vm8, %v1636_v10, 0.0  ;;  %vm1511_vm7 = vcmp.gt.f32.partialorder %v1437_v7, 0.0  ;;  %v1575_v17 = vmul.f32 0.2, %v1437_v7  ;;  %v1781_v51 = vmul.f32 0.00390625, %v1711_v47 }
 0x238   :  { %v1764_v19 = vadd.f32 %v1763_v16, %v1762_v12  ;;  %vm1510_vm9 = vcmp.gt.f32.partialorder %v1432_v15, 0.0  ;;  %v1574_v20 = vmul.f32 0.2, %v1432_v15  ;;  %v2310_v21 = vpop.f32.mrb[62].mxu1  ;;  %v1802_v61 = vrot.slane %v2330_v53, %v1801_v60 }
 0x239   :  { %v1447_v23 = vadd.f32 %v2310_v21, %v2787_v14  ;;  %v1441_v24 = vpop.f32.mrb[63].mxu1  ;;  %v1639_v25 = vsel %vm1511_vm7, %v1437_v7, %v1575_v17  ;;  %v1787_v56 = vmul.f32 %v1786_v54, %v1781_v51 }
 0x23a   :  { %v1638_v26 = vsel %vm1510_vm9, %v1432_v15, %v1574_v20  ;;  %v1766_v27 = vadd.f32 %v1765_v22, %v1764_v19  ;;  %v1442_v28 = vadd.f32 %v1441_v24, %v2787_v14  ;;  %v1769_v34 = vsel %vm1642_vm8, %v1639_v25, 0.0 }
 0x23b   :  { %v1767_v29 = vsel %vm1642_vm8, %v1638_v26, 0.0  ;;  %vm1513_vm4 = vcmp.gt.f32.partialorder %v1447_v23, 0.0  ;;  %v1577_v30 = vmul.f32 0.2, %v1447_v23 }
 0x23c   :  { %v1768_v32 = vadd.f32 %v1767_v29, %v1766_v27  ;;  %vm1512_vm10 = vcmp.gt.f32.partialorder %v1442_v28, 0.0  ;;  %v1576_v33 = vmul.f32 0.2, %v1442_v28 }
 0x23d   :  { %v1641_v35 = vsel %vm1513_vm4, %v1447_v23, %v1577_v30 }
 0x23e   :  { %v1640_v36 = vsel %vm1512_vm10, %v1442_v28, %v1576_v33  ;;  %v1770_v37 = vadd.f32 %v1769_v34, %v1768_v32  ;;  %v1773_v14 = vsel %vm1642_vm8, %v1641_v35, 0.0 }
 0x23f   :  { %v1771_v38 = vsel %vm1642_vm8, %v1640_v36, 0.0  ;;  %vm1792_vm8 = vcmask 1041409  }
 0x240   :  { %v1772_v13 = vadd.f32 %v1771_v38, %v1770_v37 }
 0x242   :  { %v1774_v40 = vadd.f32 %v1773_v14, %v1772_v13 }
 0x244   :  { %v1775_v42 = vrot.slane %v1774_v40, 4 }
 0x246   :  { %v1776_v44 = vadd.f32 %v1775_v42, %v1774_v40 }
 0x248   :  { %v1777_v41 = vrot.slane %v1776_v44, 2 }
 0x24a   :  { %v1778_v46 = vadd.f32 %v1777_v41, %v1776_v44 }
 0x24c   :  { %v1779_v48 = vrot.slane %v1778_v46, 1 }
 0x24e   :  { %v1780_v50 = vadd.f32 %v1779_v48, %v1778_v46 }
 0x250   :  { %v1782_v52 = vmul.f32 0.00390625, %v1780_v50 }
 0x252   :  { %v1788_v55 = vmul.f32 %v1786_v54, %v1782_v52 }
 0x254   :  { %v1791_v57 = vrot.slane %v1788_v55, 7 }
 0x256   :  { %v1793_v58 = vsel %vm1792_vm8, %v1791_v57, %v1787_v56 }
 0x257   :  { %v1796_v59 = vsel %vm1795_vm11, %v1793_v58, 0.0 }
 0x258   :  { %1797 = vadd.xlane.f32.xlu0 %v1796_v59 }
 0x2e5   :  { %v1798_v62 = vpop.xlane.xlu0 %1797 }
 0x2e6   :  { %v1803_v63 = vadd.f32 %v1802_v61, %v1798_v62 }
 0x2e8   :  { %v1804_v0 = vsub.f32 0.0, %v1803_v63 }
 0x2ea   :  { %v1806_v1 = vand.u32 2147483647, %v1804_v0  ;;  %v1805_v7 = vmax.f32 %v1804_v0, 0.0 }
 0x2ec   :  { %v1807_v2 = vsub.f32 0.0, %v1806_v1 }
 0x2ee   :  { %v1808_v3 = vmul.f32 1.442695, %v1807_v2 }
 0x2f0   :  { %2326 = vpow2.f32 %v1808_v3 }
 0x2fa   :  { %v2327_v4 = vpop.eup %2326 }
 0x2fb   :  { %v1810_v5 = vadd.f32 1.0, %v2327_v4 }
 0x2fd   :  { %2328 = vlog2.f32 %v1810_v5 }
 0x307   :  { %v2329_v6 = vpop.eup %2328 }
 0x308   :  { %v1812_v8 = vmul.f32 0.6931472, %v2329_v6 }
 0x30a   :  { %v1813_v9 = vadd.f32 %v1812_v8, %v1805_v7 }
 0x30c   :  { %v1815_v10 = vsel %vm1814_vm12, %v1813_v9, 0.0 }
 0x30d   :  { %1816 = vadd.xlane.f32.xlu0 %v1815_v10 }
 0x39a   :  { %v1817_v12 = vpop.xlane.xlu0 %1816 }
 0x39b   :  { %v1818_v11 = vrot.slane %v1817_v12, 4 }
 0x39d   :  { %v1819_v15 = vadd.f32 %v1818_v11, %v1817_v12 }
 0x39f   :  { %v1820_v16 = vrot.slane %v1819_v15, 2 }
 0x3a1   :  { %v1821_v17 = vadd.f32 %v1820_v16, %v1819_v15 }
 0x3a3   :  { %v1822_v18 = vrot.slane %v1821_v17, 1 }
 0x3a5   :  { %v1823_v19 = vadd.f32 %v1822_v18, %v1821_v17 }
 0x3a7   :  { %2323 = vpush %v1823_v19 }
 0x3d8   :  { %s2324_s3 = spop %2323 }
 0x3d9   :  { %s1825_s23 = smul.f32 0.5, %s2324_s3 }
 0x3db   :  { %1827 = sst [smem:[#allocation2]] %s1825_s23 }
 0x3dc   :  { %2340 = shalt.err (!%p2337_p2)
}
 0x3dd   :  { %s2343_s5 = smov [#allocation2]  }
 0x3de   :  { %1835 = dma.smem_to_hbm %s2343_s5, 16, %s2942_s4, [#allocation3]  }
 0x3df   :  { %2341 = dma.done.wait [#allocation3], 16  }
 0x3e0   :  { %2342 = vsyncadd [#allocation3], 4294967280 }
 0x3e1   :  { %1839 = sfence }
 0x3e2   :  { %1840 = vsyncpa [#allocation3], 1 }

</bundles_post_ra>
